<compile_context>
chip_gen: v6e
topology: v6e:2x2x1
jax: 0.10.0
libtpu: 0.0.40
codegen_flags: <defaults>
</compile_context>

<pallas_src>
import functools
import math

import jax
import jax.numpy as jnp
from jax.experimental import pallas as pl
from jax.experimental.pallas import tpu as pltpu

# ---------------------------------------------------------------------------
# Hyper-parameters (small shapes consistent with the module's forward).
# ---------------------------------------------------------------------------
IN_CH  = 4                 # input_channels
C1     = 4                 # num_conv_layers
C2     = 2 * C1            # num_conv_layers * 2
C3     = 2 * C1
CP     = 8                 # channel count padded to one sublane tile
KSIZE  = 3                 # kernel_size
HEIGHT = 16                # IM_HEIGHT
WIDTH  = 16                # IM_WIDTH
DENSE  = 32                # dense_layer_features
QOUT   = 16                # output_q_value
BATCH  = 2
BN_EPS = 1e-5

H1, W1 = HEIGHT - 2, WIDTH - 2        # 14x14 after conv1 (VALID, stride 1)
H2, W2 = H1 - 2, W1 - 2               # 12x12 after conv2
H3, W3 = H2 - 2, W2 - 2               # 10x10 after conv3
FLAT   = C3 * H3 * W3                 # 800

S      = HEIGHT * WIDTH               # 256-lane spatial canvas (p = h*16 + w)
MAXOFF = (KSIZE - 1) * WIDTH + (KSIZE - 1)   # 34: largest conv tap offset
S3 = S                                # conv3 output canvas width per element
S2 = S3 + MAXOFF                      # 290: conv2 output width
S1 = S2 + MAXOFF                      # 324: conv1 output width
S0 = S1 + MAXOFF                      # 358: padded input canvas width

KIN = KSIZE * KSIZE * CP              # 72: fused contraction dim per conv
TAP_OFFS = tuple(kh * WIDTH + kw for kh in range(KSIZE) for kw in range(KSIZE))

# Packed small-operand array layout (all slabs start at 8-row boundaries).
R_W1, R_W2, R_W3 = 0, 8, 16           # fused conv weights, each (CP, KIN)
R_B1, R_B2, R_B3 = 24, 32, 40         # folded biases, each (CP, 1)
R_WOUT = 48                           # output weight transposed (DENSE, QOUT)
R_BFC  = 80                           # fc bias (1, DENSE)
R_BOUT = 88                           # output bias (1, QOUT)
PK_ROWS, PK_COLS = 96, 128


# ---------------------------------------------------------------------------
# Fused Pallas kernel: full forward for one batch tile per grid step.
# ---------------------------------------------------------------------------
def _convqnet_kernel(x_ref,        # (bt*CP, S0)   channel-padded input canvases
                     wfc_ref,      # (DENSE, C3*S) lane-dense flatten-permuted FC weight
                     pk_ref,       # (PK_ROWS, PK_COLS) packed small operands
                     o_ref,        # (bt, QOUT)
                     yflat_ref,    # VMEM scratch (bt, C3*S)
                     *, bt):
    x = x_ref[...]                                              # (bt*CP, S0)

    w1 = pk_ref[R_W1:R_W1 + CP, 0:KIN]
    w2 = pk_ref[R_W2:R_W2 + CP, 0:KIN]
    w3 = pk_ref[R_W3:R_W3 + CP, 0:KIN]
    b1 = pk_ref[R_B1:R_B1 + CP, 0:1]
    b2 = pk_ref[R_B2:R_B2 + CP, 0:1]
    b3 = pk_ref[R_B3:R_B3 + CP, 0:1]
    woutT = pk_ref[R_WOUT:R_WOUT + DENSE, 0:QOUT]               # (DENSE, QOUT)
    bfc   = pk_ref[R_BFC:R_BFC + 1, 0:DENSE]                    # (1, DENSE)
    bout  = pk_ref[R_BOUT:R_BOUT + 1, 0:QOUT]                   # (1, QOUT)

    def conv_bn_relu(get_elem, w, b, s_out):
        # 3x3 VALID conv as ONE matmul: K = 9 taps x 8 channels, N = bt*s_out.
        cols = []
        for e in range(bt):
            xe = get_elem(e)                                    # (CP, s_in)
            taps = [xe[:, off:off + s_out] for off in TAP_OFFS]
            cols.append(jnp.concatenate(taps, axis=0))          # (KIN, s_out)
        rhs = jnp.concatenate(cols, axis=1)                     # (KIN, bt*s_out)
        y = jnp.dot(w, rhs, preferred_element_type=jnp.float32)  # (CP, bt*s_out)
        # BN folded into w/b offline; bias broadcasts over lanes.
        return jnp.maximum(y + b, 0.0)

    y1 = conv_bn_relu(lambda e: x[e * CP:(e + 1) * CP, :],  w1, b1, S1)   # (CP, bt*S1)
    y2 = conv_bn_relu(lambda e: y1[:, e * S1:(e + 1) * S1], w2, b2, S2)   # (CP, bt*S2)
    y3 = conv_bn_relu(lambda e: y2[:, e * S2:(e + 1) * S2], w3, b3, S3)   # (C3, bt*S)

    # Explicitly zero canvas positions outside the valid 10x10 conv3 output
    # (wfc also has zeros there; this guards against any non-finite garbage).
    q = jax.lax.broadcasted_iota(jnp.int32, y3.shape, 1)
    p = q & (S - 1)                                             # position inside canvas
    valid = ((p & (WIDTH - 1)) < W3) & (p < H3 * WIDTH)
    y3 = jnp.where(valid, y3, 0.0)

    # Flatten to (bt, C3*S) with PyTorch NCHW order baked into wfc's columns.
    for e in range(bt):
        for c in range(C3):
            yflat_ref[e:e + 1, c * S:(c + 1) * S] = y3[c:c + 1, e * S:(e + 1) * S]

    # fully_connected_layer: single matmul with M = bt, K = 2048, N = DENSE.
    # wfc is stored lane-dense as (DENSE, C3*S); contract the lane axis of both.
    h = jax.lax.dot_general(yflat_ref[...], wfc_ref[...],
                            (((1,), (1,)), ((), ())),
                            preferred_element_type=jnp.float32)  # (bt, DENSE)
    h = jnp.maximum(h + bfc, 0.0)                                # ReLU

    # output_layer
    o_ref[...] = jnp.dot(h, woutT, preferred_element_type=jnp.float32) + bout


def _convqnet_pallas(x2d, wfc, pk):
    n = x2d.shape[0] // CP
    # Whole batch per grid step here; for large N pick a multiple of 8 and keep
    # >= 2 grid steps on v7x so both TensorCores get work.
    bt = n
    grid = (n // bt,)
    kernel = functools.partial(_convqnet_kernel, bt=bt)
    return pl.pallas_call(
        kernel,
        out_shape=jax.ShapeDtypeStruct((n, QOUT), jnp.float32),
        grid=grid,
        in_specs=[
            pl.BlockSpec((bt * CP, S0), lambda i: (i, 0)),
            pl.BlockSpec((DENSE, C3 * S), lambda i: (0, 0)),
            pl.BlockSpec((PK_ROWS, PK_COLS), lambda i: (0, 0)),
        ],
        out_specs=pl.BlockSpec((bt, QOUT), lambda i: (i, 0)),
        scratch_shapes=[pltpu.VMEM((bt, C3 * S), jnp.float32)],
        compiler_params=pltpu.CompilerParams(
            dimension_semantics=("parallel",)),
    )(x2d, wfc, pk)


@jax.jit
def convqnet_forward(x, prep):
    """x: (N, IN_CH, 16, 16) float32 -> (N, QOUT) float32."""
    n = x.shape[0]
    xc = x.reshape(n, IN_CH, S)
    # Pad channels to CP (zeros) and lane-pad each canvas to S0.
    xc = jnp.pad(xc, ((0, 0), (0, CP - IN_CH), (0, S0 - S)))
    x2d = xc.reshape(n * CP, S0)
    return _convqnet_pallas(x2d, prep["wfc"], prep["pk"])


# ---------------------------------------------------------------------------
# Parameter init (PyTorch layouts) and offline matmul-ready layout prep.
# ---------------------------------------------------------------------------
def make_params(key):
    ks = jax.random.split(key, 22)

    def uni(k, shape, fan_in):
        b = 1.0 / math.sqrt(fan_in)
        return jax.random.uniform(k, shape, jnp.float32, -b, b)

    def bn(k0, k1, k2, k3, c):
        return {
            "g": jax.random.uniform(k0, (c,), jnp.float32, 0.8, 1.2),
            "b": 0.1 * jax.random.normal(k1, (c,), jnp.float32),
            "m": 0.1 * jax.random.normal(k2, (c,), jnp.float32),
            "v": jax.random.uniform(k3, (c,), jnp.float32, 0.5, 1.5),
        }

    p = {
        "conv1_w": uni(ks[0], (C1, IN_CH, KSIZE, KSIZE), IN_CH * KSIZE * KSIZE),
        "conv1_b": uni(ks[1], (C1,), IN_CH * KSIZE * KSIZE),
        "conv2_w": uni(ks[6], (C2, C1, KSIZE, KSIZE), C1 * KSIZE * KSIZE),
        "conv2_b": uni(ks[7], (C2,), C1 * KSIZE * KSIZE),
        "conv3_w": uni(ks[12], (C3, C2, KSIZE, KSIZE), C2 * KSIZE * KSIZE),
        "conv3_b": uni(ks[13], (C3,), C2 * KSIZE * KSIZE),
        "fc_w": uni(ks[18], (DENSE, FLAT), FLAT),
        "fc_b": uni(ks[19], (DENSE,), FLAT),
        "out_w": uni(ks[20], (QOUT, DENSE), DENSE),
        "out_b": uni(ks[21], (QOUT,), DENSE),
    }
    bn1 = bn(ks[2], ks[3], ks[4], ks[5], C1)
    bn2 = bn(ks[8], ks[9], ks[10], ks[11], C2)
    bn3 = bn(ks[14], ks[15], ks[16], ks[17], C3)
    for name, d in (("bn1", bn1), ("bn2", bn2), ("bn3", bn3)):
        for k, v in d.items():
            p[f"{name}_{k}"] = v
    return p


def prepare_params(p):
    """One-time offline layout: BN fold, tap fusion (channels padded to 8),
    lane-dense flatten-permuted FC weight, packed small-operand array."""
    def fold(w, b, g, beta, mean, var):
        s = g / jnp.sqrt(var + BN_EPS)                      # per out-channel scale
        return w * s[:, None, None, None], (b - mean) * s + beta

    def fuse_pad(w):                                        # (O,I,3,3) -> (CP, 9*CP)
        o, i = w.shape[0], w.shape[1]
        wf = jnp.transpose(w, (0, 2, 3, 1))                 # (O, 3, 3, I)
        wf = jnp.pad(wf, ((0, CP - o), (0, 0), (0, 0), (0, CP - i)))
        return wf.reshape(CP, KIN)                          # col = (kh*3+kw)*CP + c

    def pad_bias(b):                                        # (O,) -> (CP, 1)
        return jnp.pad(b, (0, CP - b.shape[0]))[:, None]

    w1, b1 = fold(p["conv1_w"], p["conv1_b"], p["bn1_g"], p["bn1_b"], p["bn1_m"], p["bn1_v"])
    w2, b2 = fold(p["conv2_w"], p["conv2_b"], p["bn2_g"], p["bn2_b"], p["bn2_m"], p["bn2_v"])
    w3, b3 = fold(p["conv3_w"], p["conv3_b"], p["bn3_g"], p["bn3_b"], p["bn3_m"], p["bn3_v"])

    # wfc: (DENSE, C3*S) lane-dense; PyTorch (c,h,w) flatten order baked into the
    # columns, zero at invalid canvas positions (h>=10 or w>=10).
    wfc = p["fc_w"].reshape(DENSE, C3, H3, W3)
    wfc = jnp.pad(wfc, ((0, 0), (0, 0), (0, HEIGHT - H3), (0, WIDTH - W3)))
    wfc = wfc.reshape(DENSE, C3 * S)

    # Pack the small operands into one lane-dense (PK_ROWS, 128) array.
    pk = jnp.zeros((PK_ROWS, PK_COLS), jnp.float32)

    def put(buf, r, a):
        return buf.at[r:r + a.shape[0], 0:a.shape[1]].set(a)

    pk = put(pk, R_W1, fuse_pad(w1)); pk = put(pk, R_B1, pad_bias(b1))
    pk = put(pk, R_W2, fuse_pad(w2)); pk = put(pk, R_B2, pad_bias(b2))
    pk = put(pk, R_W3, fuse_pad(w3)); pk = put(pk, R_B3, pad_bias(b3))
    pk = put(pk, R_WOUT, p["out_w"].T)                      # (DENSE, QOUT)
    pk = put(pk, R_BFC, p["fc_b"][None, :])
    pk = put(pk, R_BOUT, p["out_b"][None, :])

    return {"wfc": wfc, "pk": pk}


# ---------------------------------------------------------------------------
# Pure-JAX (XLA) reference for correctness checking.
# ---------------------------------------------------------------------------
def reference_forward(x, p):
    def conv(x, w, b):
        y = jax.lax.conv_general_dilated(
            x, w, window_strides=(1, 1), padding="VALID",
            dimension_numbers=("NCHW", "OIHW", "NCHW"))
        return y + b[None, :, None, None]

    def bn(x, g, beta, m, v):
        inv = g / jnp.sqrt(v + BN_EPS)
        return (x - m[None, :, None, None]) * inv[None, :, None, None] \
            + beta[None, :, None, None]

    y = jax.nn.relu(bn(conv(x, p["conv1_w"], p["conv1_b"]),
                       p["bn1_g"], p["bn1_b"], p["bn1_m"], p["bn1_v"]))
    y = jax.nn.relu(bn(conv(y, p["conv2_w"], p["conv2_b"]),
                       p["bn2_g"], p["bn2_b"], p["bn2_m"], p["bn2_v"]))
    y = jax.nn.relu(bn(conv(y, p["conv3_w"], p["conv3_b"]),
                       p["bn3_g"], p["bn3_b"], p["bn3_m"], p["bn3_v"]))
    flat = y.reshape(y.shape[0], -1)
    h = jax.nn.relu(flat @ p["fc_w"].T + p["fc_b"][None, :])
    return h @ p["out_w"].T + p["out_b"][None, :]


if __name__ == "__main__":
    key = jax.random.PRNGKey(0)
    pkey, xkey = jax.random.split(key)

    params = make_params(pkey)
    prep = prepare_params(params)          # offline, outside the forward pass

    x = jax.random.normal(xkey, (BATCH, IN_CH, HEIGHT, WIDTH), dtype=jnp.float32)

    out = convqnet_forward(x, prep)
    out = jax.block_until_ready(out)
    assert out.shape == (BATCH, QOUT)

    ref = reference_forward(x, params)
    max_err = float(jnp.max(jnp.abs(out - ref)))
    assert jnp.allclose(out, ref, rtol=1e-3, atol=1e-3), f"max abs err {max_err}"

    print("KERNEL_OK")
</pallas_src>

<mosaic_0001>
module attributes {stable_mosaic.version = 11 : i64} {
  func.func @_convqnet_kernel(%arg0: i32, %arg1: memref<16x358xf32, #tpu.memory_space<vmem>>, %arg2: memref<32x2048xf32, #tpu.memory_space<vmem>>, %arg3: memref<96x128xf32, #tpu.memory_space<vmem>>, %arg4: memref<2x16xf32, #tpu.memory_space<vmem>>, %arg5: memref<2x2048xf32, #tpu.memory_space<vmem>>) attributes {dimension_semantics = [#tpu.dimension_semantics<parallel>], iteration_bounds = array<i64: 1>, scalar_prefetch = 0 : i64, scratch_operands = 1 : i64, tpu.core_type = #tpu.core_type<tc>, window_params = [{transform_indices = @transform_0, window_bounds = array<i64: 16, 358>}, {pipeline_mode = #tpu.pipeline_mode<synchronous>, transform_indices = @transform_1, window_bounds = array<i64: 32, 2048>}, {pipeline_mode = #tpu.pipeline_mode<synchronous>, transform_indices = @transform_2, window_bounds = array<i64: 96, 128>}, {transform_indices = @transform_3, window_bounds = array<i64: 2, 16>}]} {
    %c0 = arith.constant 0 : index
    %c0_0 = arith.constant 0 : index
    %0 = vector.load %arg1[%c0, %c0_0] : memref<16x358xf32, #tpu.memory_space<vmem>>, vector<16x358xf32>
    %c0_1 = arith.constant 0 : index
    %c0_2 = arith.constant 0 : index
    %1 = vector.load %arg3[%c0_1, %c0_2] : memref<96x128xf32, #tpu.memory_space<vmem>>, vector<8x72xf32>
    %c8 = arith.constant 8 : index
    %c0_3 = arith.constant 0 : index
    %2 = vector.load %arg3[%c8, %c0_3] : memref<96x128xf32, #tpu.memory_space<vmem>>, vector<8x72xf32>
    %c16 = arith.constant 16 : index
    %c0_4 = arith.constant 0 : index
    %3 = vector.load %arg3[%c16, %c0_4] : memref<96x128xf32, #tpu.memory_space<vmem>>, vector<8x72xf32>
    %c24 = arith.constant 24 : index
    %c0_5 = arith.constant 0 : index
    %4 = vector.load %arg3[%c24, %c0_5] : memref<96x128xf32, #tpu.memory_space<vmem>>, vector<8x1xf32>
    %c32 = arith.constant 32 : index
    %c0_6 = arith.constant 0 : index
    %5 = vector.load %arg3[%c32, %c0_6] : memref<96x128xf32, #tpu.memory_space<vmem>>, vector<8x1xf32>
    %c40 = arith.constant 40 : index
    %c0_7 = arith.constant 0 : index
    %6 = vector.load %arg3[%c40, %c0_7] : memref<96x128xf32, #tpu.memory_space<vmem>>, vector<8x1xf32>
    %c48 = arith.constant 48 : index
    %c0_8 = arith.constant 0 : index
    %7 = vector.load %arg3[%c48, %c0_8] : memref<96x128xf32, #tpu.memory_space<vmem>>, vector<32x16xf32>
    %c80 = arith.constant 80 : index
    %c0_9 = arith.constant 0 : index
    %8 = vector.load %arg3[%c80, %c0_9] : memref<96x128xf32, #tpu.memory_space<vmem>>, vector<1x32xf32>
    %c88 = arith.constant 88 : index
    %c0_10 = arith.constant 0 : index
    %9 = vector.load %arg3[%c88, %c0_10] : memref<96x128xf32, #tpu.memory_space<vmem>>, vector<1x16xf32>
    %10 = vector.extract_strided_slice %0 {offsets = [0, 0], sizes = [8, 358], strides = [1, 1]} : vector<16x358xf32> to vector<8x358xf32>
    %11 = vector.extract_strided_slice %10 {offsets = [0, 0], sizes = [8, 324], strides = [1, 1]} : vector<8x358xf32> to vector<8x324xf32>
    %12 = vector.extract_strided_slice %10 {offsets = [0, 1], sizes = [8, 324], strides = [1, 1]} : vector<8x358xf32> to vector<8x324xf32>
    %13 = vector.extract_strided_slice %10 {offsets = [0, 2], sizes = [8, 324], strides = [1, 1]} : vector<8x358xf32> to vector<8x324xf32>
    %14 = vector.extract_strided_slice %10 {offsets = [0, 16], sizes = [8, 324], strides = [1, 1]} : vector<8x358xf32> to vector<8x324xf32>
    %15 = vector.extract_strided_slice %10 {offsets = [0, 17], sizes = [8, 324], strides = [1, 1]} : vector<8x358xf32> to vector<8x324xf32>
    %16 = vector.extract_strided_slice %10 {offsets = [0, 18], sizes = [8, 324], strides = [1, 1]} : vector<8x358xf32> to vector<8x324xf32>
    %17 = vector.extract_strided_slice %10 {offsets = [0, 32], sizes = [8, 324], strides = [1, 1]} : vector<8x358xf32> to vector<8x324xf32>
    %18 = vector.extract_strided_slice %10 {offsets = [0, 33], sizes = [8, 324], strides = [1, 1]} : vector<8x358xf32> to vector<8x324xf32>
    %19 = vector.extract_strided_slice %10 {offsets = [0, 34], sizes = [8, 324], strides = [1, 1]} : vector<8x358xf32> to vector<8x324xf32>
    %20 = tpu.concatenate %11, %12, %13, %14, %15, %16, %17, %18, %19 in 0 : vector<8x324xf32>, vector<8x324xf32>, vector<8x324xf32>, vector<8x324xf32>, vector<8x324xf32>, vector<8x324xf32>, vector<8x324xf32>, vector<8x324xf32>, vector<8x324xf32> -> vector<72x324xf32>
    %21 = vector.extract_strided_slice %0 {offsets = [8, 0], sizes = [8, 358], strides = [1, 1]} : vector<16x358xf32> to vector<8x358xf32>
    %22 = vector.extract_strided_slice %21 {offsets = [0, 0], sizes = [8, 324], strides = [1, 1]} : vector<8x358xf32> to vector<8x324xf32>
    %23 = vector.extract_strided_slice %21 {offsets = [0, 1], sizes = [8, 324], strides = [1, 1]} : vector<8x358xf32> to vector<8x324xf32>
    %24 = vector.extract_strided_slice %21 {offsets = [0, 2], sizes = [8, 324], strides = [1, 1]} : vector<8x358xf32> to vector<8x324xf32>
    %25 = vector.extract_strided_slice %21 {offsets = [0, 16], sizes = [8, 324], strides = [1, 1]} : vector<8x358xf32> to vector<8x324xf32>
    %26 = vector.extract_strided_slice %21 {offsets = [0, 17], sizes = [8, 324], strides = [1, 1]} : vector<8x358xf32> to vector<8x324xf32>
    %27 = vector.extract_strided_slice %21 {offsets = [0, 18], sizes = [8, 324], strides = [1, 1]} : vector<8x358xf32> to vector<8x324xf32>
    %28 = vector.extract_strided_slice %21 {offsets = [0, 32], sizes = [8, 324], strides = [1, 1]} : vector<8x358xf32> to vector<8x324xf32>
    %29 = vector.extract_strided_slice %21 {offsets = [0, 33], sizes = [8, 324], strides = [1, 1]} : vector<8x358xf32> to vector<8x324xf32>
    %30 = vector.extract_strided_slice %21 {offsets = [0, 34], sizes = [8, 324], strides = [1, 1]} : vector<8x358xf32> to vector<8x324xf32>
    %31 = tpu.concatenate %22, %23, %24, %25, %26, %27, %28, %29, %30 in 0 : vector<8x324xf32>, vector<8x324xf32>, vector<8x324xf32>, vector<8x324xf32>, vector<8x324xf32>, vector<8x324xf32>, vector<8x324xf32>, vector<8x324xf32>, vector<8x324xf32> -> vector<72x324xf32>
    %32 = tpu.concatenate %20, %31 in 1 : vector<72x324xf32>, vector<72x324xf32> -> vector<72x648xf32>
    %cst = arith.constant dense<0.000000e+00> : vector<8x648xf32>
    %33 = tpu.matmul %1, %32, %cst {dimension_numbers = #tpu.dot_dimension_numbers<[1], [0], [0], [1], [0, 0, 1, 1], [], []>} : vector<8x72xf32>, vector<72x648xf32>, vector<8x648xf32> -> vector<8x648xf32>
    %34 = vector.broadcast %4 : vector<8x1xf32> to vector<8x648xf32>
    %35 = arith.addf %33, %34 : vector<8x648xf32>
    %cst_11 = arith.constant 0.000000e+00 : f32
    %36 = vector.broadcast %cst_11 : f32 to vector<8x648xf32>
    %37 = arith.maximumf %35, %36 : vector<8x648xf32>
    %38 = vector.extract_strided_slice %37 {offsets = [0, 0], sizes = [8, 324], strides = [1, 1]} : vector<8x648xf32> to vector<8x324xf32>
    %39 = vector.extract_strided_slice %38 {offsets = [0, 0], sizes = [8, 290], strides = [1, 1]} : vector<8x324xf32> to vector<8x290xf32>
    %40 = vector.extract_strided_slice %38 {offsets = [0, 1], sizes = [8, 290], strides = [1, 1]} : vector<8x324xf32> to vector<8x290xf32>
    %41 = vector.extract_strided_slice %38 {offsets = [0, 2], sizes = [8, 290], strides = [1, 1]} : vector<8x324xf32> to vector<8x290xf32>
    %42 = vector.extract_strided_slice %38 {offsets = [0, 16], sizes = [8, 290], strides = [1, 1]} : vector<8x324xf32> to vector<8x290xf32>
    %43 = vector.extract_strided_slice %38 {offsets = [0, 17], sizes = [8, 290], strides = [1, 1]} : vector<8x324xf32> to vector<8x290xf32>
    %44 = vector.extract_strided_slice %38 {offsets = [0, 18], sizes = [8, 290], strides = [1, 1]} : vector<8x324xf32> to vector<8x290xf32>
    %45 = vector.extract_strided_slice %38 {offsets = [0, 32], sizes = [8, 290], strides = [1, 1]} : vector<8x324xf32> to vector<8x290xf32>
    %46 = vector.extract_strided_slice %38 {offsets = [0, 33], sizes = [8, 290], strides = [1, 1]} : vector<8x324xf32> to vector<8x290xf32>
    %47 = vector.extract_strided_slice %38 {offsets = [0, 34], sizes = [8, 290], strides = [1, 1]} : vector<8x324xf32> to vector<8x290xf32>
    %48 = tpu.concatenate %39, %40, %41, %42, %43, %44, %45, %46, %47 in 0 : vector<8x290xf32>, vector<8x290xf32>, vector<8x290xf32>, vector<8x290xf32>, vector<8x290xf32>, vector<8x290xf32>, vector<8x290xf32>, vector<8x290xf32>, vector<8x290xf32> -> vector<72x290xf32>
    %49 = vector.extract_strided_slice %37 {offsets = [0, 324], sizes = [8, 324], strides = [1, 1]} : vector<8x648xf32> to vector<8x324xf32>
    %50 = vector.extract_strided_slice %49 {offsets = [0, 0], sizes = [8, 290], strides = [1, 1]} : vector<8x324xf32> to vector<8x290xf32>
    %51 = vector.extract_strided_slice %49 {offsets = [0, 1], sizes = [8, 290], strides = [1, 1]} : vector<8x324xf32> to vector<8x290xf32>
    %52 = vector.extract_strided_slice %49 {offsets = [0, 2], sizes = [8, 290], strides = [1, 1]} : vector<8x324xf32> to vector<8x290xf32>
    %53 = vector.extract_strided_slice %49 {offsets = [0, 16], sizes = [8, 290], strides = [1, 1]} : vector<8x324xf32> to vector<8x290xf32>
    %54 = vector.extract_strided_slice %49 {offsets = [0, 17], sizes = [8, 290], strides = [1, 1]} : vector<8x324xf32> to vector<8x290xf32>
    %55 = vector.extract_strided_slice %49 {offsets = [0, 18], sizes = [8, 290], strides = [1, 1]} : vector<8x324xf32> to vector<8x290xf32>
    %56 = vector.extract_strided_slice %49 {offsets = [0, 32], sizes = [8, 290], strides = [1, 1]} : vector<8x324xf32> to vector<8x290xf32>
    %57 = vector.extract_strided_slice %49 {offsets = [0, 33], sizes = [8, 290], strides = [1, 1]} : vector<8x324xf32> to vector<8x290xf32>
    %58 = vector.extract_strided_slice %49 {offsets = [0, 34], sizes = [8, 290], strides = [1, 1]} : vector<8x324xf32> to vector<8x290xf32>
    %59 = tpu.concatenate %50, %51, %52, %53, %54, %55, %56, %57, %58 in 0 : vector<8x290xf32>, vector<8x290xf32>, vector<8x290xf32>, vector<8x290xf32>, vector<8x290xf32>, vector<8x290xf32>, vector<8x290xf32>, vector<8x290xf32>, vector<8x290xf32> -> vector<72x290xf32>
    %60 = tpu.concatenate %48, %59 in 1 : vector<72x290xf32>, vector<72x290xf32> -> vector<72x580xf32>
    %cst_12 = arith.constant dense<0.000000e+00> : vector<8x580xf32>
    %61 = tpu.matmul %2, %60, %cst_12 {dimension_numbers = #tpu.dot_dimension_numbers<[1], [0], [0], [1], [0, 0, 1, 1], [], []>} : vector<8x72xf32>, vector<72x580xf32>, vector<8x580xf32> -> vector<8x580xf32>
    %62 = vector.broadcast %5 : vector<8x1xf32> to vector<8x580xf32>
    %63 = arith.addf %61, %62 : vector<8x580xf32>
    %cst_13 = arith.constant 0.000000e+00 : f32
    %64 = vector.broadcast %cst_13 : f32 to vector<8x580xf32>
    %65 = arith.maximumf %63, %64 : vector<8x580xf32>
    %66 = vector.extract_strided_slice %65 {offsets = [0, 0], sizes = [8, 290], strides = [1, 1]} : vector<8x580xf32> to vector<8x290xf32>
    %67 = vector.extract_strided_slice %66 {offsets = [0, 0], sizes = [8, 256], strides = [1, 1]} : vector<8x290xf32> to vector<8x256xf32>
    %68 = vector.extract_strided_slice %66 {offsets = [0, 1], sizes = [8, 256], strides = [1, 1]} : vector<8x290xf32> to vector<8x256xf32>
    %69 = vector.extract_strided_slice %66 {offsets = [0, 2], sizes = [8, 256], strides = [1, 1]} : vector<8x290xf32> to vector<8x256xf32>
    %70 = vector.extract_strided_slice %66 {offsets = [0, 16], sizes = [8, 256], strides = [1, 1]} : vector<8x290xf32> to vector<8x256xf32>
    %71 = vector.extract_strided_slice %66 {offsets = [0, 17], sizes = [8, 256], strides = [1, 1]} : vector<8x290xf32> to vector<8x256xf32>
    %72 = vector.extract_strided_slice %66 {offsets = [0, 18], sizes = [8, 256], strides = [1, 1]} : vector<8x290xf32> to vector<8x256xf32>
    %73 = vector.extract_strided_slice %66 {offsets = [0, 32], sizes = [8, 256], strides = [1, 1]} : vector<8x290xf32> to vector<8x256xf32>
    %74 = vector.extract_strided_slice %66 {offsets = [0, 33], sizes = [8, 256], strides = [1, 1]} : vector<8x290xf32> to vector<8x256xf32>
    %75 = vector.extract_strided_slice %66 {offsets = [0, 34], sizes = [8, 256], strides = [1, 1]} : vector<8x290xf32> to vector<8x256xf32>
    %76 = tpu.concatenate %67, %68, %69, %70, %71, %72, %73, %74, %75 in 0 : vector<8x256xf32>, vector<8x256xf32>, vector<8x256xf32>, vector<8x256xf32>, vector<8x256xf32>, vector<8x256xf32>, vector<8x256xf32>, vector<8x256xf32>, vector<8x256xf32> -> vector<72x256xf32>
    %77 = vector.extract_strided_slice %65 {offsets = [0, 290], sizes = [8, 290], strides = [1, 1]} : vector<8x580xf32> to vector<8x290xf32>
    %78 = vector.extract_strided_slice %77 {offsets = [0, 0], sizes = [8, 256], strides = [1, 1]} : vector<8x290xf32> to vector<8x256xf32>
    %79 = vector.extract_strided_slice %77 {offsets = [0, 1], sizes = [8, 256], strides = [1, 1]} : vector<8x290xf32> to vector<8x256xf32>
    %80 = vector.extract_strided_slice %77 {offsets = [0, 2], sizes = [8, 256], strides = [1, 1]} : vector<8x290xf32> to vector<8x256xf32>
    %81 = vector.extract_strided_slice %77 {offsets = [0, 16], sizes = [8, 256], strides = [1, 1]} : vector<8x290xf32> to vector<8x256xf32>
    %82 = vector.extract_strided_slice %77 {offsets = [0, 17], sizes = [8, 256], strides = [1, 1]} : vector<8x290xf32> to vector<8x256xf32>
    %83 = vector.extract_strided_slice %77 {offsets = [0, 18], sizes = [8, 256], strides = [1, 1]} : vector<8x290xf32> to vector<8x256xf32>
    %84 = vector.extract_strided_slice %77 {offsets = [0, 32], sizes = [8, 256], strides = [1, 1]} : vector<8x290xf32> to vector<8x256xf32>
    %85 = vector.extract_strided_slice %77 {offsets = [0, 33], sizes = [8, 256], strides = [1, 1]} : vector<8x290xf32> to vector<8x256xf32>
    %86 = vector.extract_strided_slice %77 {offsets = [0, 34], sizes = [8, 256], strides = [1, 1]} : vector<8x290xf32> to vector<8x256xf32>
    %87 = tpu.concatenate %78, %79, %80, %81, %82, %83, %84, %85, %86 in 0 : vector<8x256xf32>, vector<8x256xf32>, vector<8x256xf32>, vector<8x256xf32>, vector<8x256xf32>, vector<8x256xf32>, vector<8x256xf32>, vector<8x256xf32>, vector<8x256xf32> -> vector<72x256xf32>
    %88 = tpu.concatenate %76, %87 in 1 : vector<72x256xf32>, vector<72x256xf32> -> vector<72x512xf32>
    %cst_14 = arith.constant dense<0.000000e+00> : vector<8x512xf32>
    %89 = tpu.matmul %3, %88, %cst_14 {dimension_numbers = #tpu.dot_dimension_numbers<[1], [0], [0], [1], [0, 0, 1, 1], [], []>} : vector<8x72xf32>, vector<72x512xf32>, vector<8x512xf32> -> vector<8x512xf32>
    %90 = vector.broadcast %6 : vector<8x1xf32> to vector<8x512xf32>
    %91 = arith.addf %89, %90 : vector<8x512xf32>
    %cst_15 = arith.constant 0.000000e+00 : f32
    %92 = vector.broadcast %cst_15 : f32 to vector<8x512xf32>
    %93 = arith.maximumf %91, %92 : vector<8x512xf32>
    %94 = tpu.iota {dimensions = array<i32: 1>} : vector<8x512xi32>
    %c255_i32 = arith.constant 255 : i32
    %95 = vector.broadcast %c255_i32 : i32 to vector<8x512xi32>
    %96 = arith.andi %94, %95 : vector<8x512xi32>
    %c15_i32 = arith.constant 15 : i32
    %97 = vector.broadcast %c15_i32 : i32 to vector<8x512xi32>
    %98 = arith.andi %96, %97 : vector<8x512xi32>
    %c10_i32 = arith.constant 10 : i32
    %99 = vector.broadcast %c10_i32 : i32 to vector<8x512xi32>
    %100 = arith.cmpi slt, %98, %99 : vector<8x512xi32>
    %c160_i32 = arith.constant 160 : i32
    %101 = vector.broadcast %c160_i32 : i32 to vector<8x512xi32>
    %102 = arith.cmpi slt, %96, %101 : vector<8x512xi32>
    %103 = arith.andi %100, %102 : vector<8x512xi1>
    %cst_16 = arith.constant 0.000000e+00 : f32
    %104 = vector.broadcast %cst_16 : f32 to vector<8x512xf32>
    %105 = arith.select %103, %93, %104 : vector<8x512xi1>, vector<8x512xf32>
    %106 = vector.extract_strided_slice %105 {offsets = [0, 0], sizes = [1, 256], strides = [1, 1]} : vector<8x512xf32> to vector<1x256xf32>
    %c0_17 = arith.constant 0 : index
    %c0_18 = arith.constant 0 : index
    %107 = vector.load %arg5[%c0_17, %c0_18] : memref<2x2048xf32, #tpu.memory_space<vmem>>, vector<1x256xf32>
    tpu.vector_store %arg5[%c0_17, %c0_18], %106 {strides = array<i32>} : memref<2x2048xf32, #tpu.memory_space<vmem>>, vector<1x256xf32>,
    %108 = vector.extract_strided_slice %105 {offsets = [1, 0], sizes = [1, 256], strides = [1, 1]} : vector<8x512xf32> to vector<1x256xf32>
    %c0_19 = arith.constant 0 : index
    %c256 = arith.constant 256 : index
    %109 = vector.load %arg5[%c0_19, %c256] : memref<2x2048xf32, #tpu.memory_space<vmem>>, vector<1x256xf32>
    tpu.vector_store %arg5[%c0_19, %c256], %108 {strides = array<i32>} : memref<2x2048xf32, #tpu.memory_space<vmem>>, vector<1x256xf32>,
    %110 = vector.extract_strided_slice %105 {offsets = [2, 0], sizes = [1, 256], strides = [1, 1]} : vector<8x512xf32> to vector<1x256xf32>
    %c0_20 = arith.constant 0 : index
    %c512 = arith.constant 512 : index
    %111 = vector.load %arg5[%c0_20, %c512] : memref<2x2048xf32, #tpu.memory_space<vmem>>, vector<1x256xf32>
    tpu.vector_store %arg5[%c0_20, %c512], %110 {strides = array<i32>} : memref<2x2048xf32, #tpu.memory_space<vmem>>, vector<1x256xf32>,
    %112 = vector.extract_strided_slice %105 {offsets = [3, 0], sizes = [1, 256], strides = [1, 1]} : vector<8x512xf32> to vector<1x256xf32>
    %c0_21 = arith.constant 0 : index
    %c768 = arith.constant 768 : index
    %113 = vector.load %arg5[%c0_21, %c768] : memref<2x2048xf32, #tpu.memory_space<vmem>>, vector<1x256xf32>
    tpu.vector_store %arg5[%c0_21, %c768], %112 {strides = array<i32>} : memref<2x2048xf32, #tpu.memory_space<vmem>>, vector<1x256xf32>,
    %114 = vector.extract_strided_slice %105 {offsets = [4, 0], sizes = [1, 256], strides = [1, 1]} : vector<8x512xf32> to vector<1x256xf32>
    %c0_22 = arith.constant 0 : index
    %c1024 = arith.constant 1024 : index
    %115 = vector.load %arg5[%c0_22, %c1024] : memref<2x2048xf32, #tpu.memory_space<vmem>>, vector<1x256xf32>
    tpu.vector_store %arg5[%c0_22, %c1024], %114 {strides = array<i32>} : memref<2x2048xf32, #tpu.memory_space<vmem>>, vector<1x256xf32>,
    %116 = vector.extract_strided_slice %105 {offsets = [5, 0], sizes = [1, 256], strides = [1, 1]} : vector<8x512xf32> to vector<1x256xf32>
    %c0_23 = arith.constant 0 : index
    %c1280 = arith.constant 1280 : index
    %117 = vector.load %arg5[%c0_23, %c1280] : memref<2x2048xf32, #tpu.memory_space<vmem>>, vector<1x256xf32>
    tpu.vector_store %arg5[%c0_23, %c1280], %116 {strides = array<i32>} : memref<2x2048xf32, #tpu.memory_space<vmem>>, vector<1x256xf32>,
    %118 = vector.extract_strided_slice %105 {offsets = [6, 0], sizes = [1, 256], strides = [1, 1]} : vector<8x512xf32> to vector<1x256xf32>
    %c0_24 = arith.constant 0 : index
    %c1536 = arith.constant 1536 : index
    %119 = vector.load %arg5[%c0_24, %c1536] : memref<2x2048xf32, #tpu.memory_space<vmem>>, vector<1x256xf32>
    tpu.vector_store %arg5[%c0_24, %c1536], %118 {strides = array<i32>} : memref<2x2048xf32, #tpu.memory_space<vmem>>, vector<1x256xf32>,
    %120 = vector.extract_strided_slice %105 {offsets = [7, 0], sizes = [1, 256], strides = [1, 1]} : vector<8x512xf32> to vector<1x256xf32>
    %c0_25 = arith.constant 0 : index
    %c1792 = arith.constant 1792 : index
    %121 = vector.load %arg5[%c0_25, %c1792] : memref<2x2048xf32, #tpu.memory_space<vmem>>, vector<1x256xf32>
    tpu.vector_store %arg5[%c0_25, %c1792], %120 {strides = array<i32>} : memref<2x2048xf32, #tpu.memory_space<vmem>>, vector<1x256xf32>,
    %122 = vector.extract_strided_slice %105 {offsets = [0, 256], sizes = [1, 256], strides = [1, 1]} : vector<8x512xf32> to vector<1x256xf32>
    %c1 = arith.constant 1 : index
    %c0_26 = arith.constant 0 : index
    %123 = vector.load %arg5[%c1, %c0_26] : memref<2x2048xf32, #tpu.memory_space<vmem>>, vector<1x256xf32>
    tpu.vector_store %arg5[%c1, %c0_26], %122 {strides = array<i32>} : memref<2x2048xf32, #tpu.memory_space<vmem>>, vector<1x256xf32>,
    %124 = vector.extract_strided_slice %105 {offsets = [1, 256], sizes = [1, 256], strides = [1, 1]} : vector<8x512xf32> to vector<1x256xf32>
    %c1_27 = arith.constant 1 : index
    %c256_28 = arith.constant 256 : index
    %125 = vector.load %arg5[%c1_27, %c256_28] : memref<2x2048xf32, #tpu.memory_space<vmem>>, vector<1x256xf32>
    tpu.vector_store %arg5[%c1_27, %c256_28], %124 {strides = array<i32>} : memref<2x2048xf32, #tpu.memory_space<vmem>>, vector<1x256xf32>,
    %126 = vector.extract_strided_slice %105 {offsets = [2, 256], sizes = [1, 256], strides = [1, 1]} : vector<8x512xf32> to vector<1x256xf32>
    %c1_29 = arith.constant 1 : index
    %c512_30 = arith.constant 512 : index
    %127 = vector.load %arg5[%c1_29, %c512_30] : memref<2x2048xf32, #tpu.memory_space<vmem>>, vector<1x256xf32>
    tpu.vector_store %arg5[%c1_29, %c512_30], %126 {strides = array<i32>} : memref<2x2048xf32, #tpu.memory_space<vmem>>, vector<1x256xf32>,
    %128 = vector.extract_strided_slice %105 {offsets = [3, 256], sizes = [1, 256], strides = [1, 1]} : vector<8x512xf32> to vector<1x256xf32>
    %c1_31 = arith.constant 1 : index
    %c768_32 = arith.constant 768 : index
    %129 = vector.load %arg5[%c1_31, %c768_32] : memref<2x2048xf32, #tpu.memory_space<vmem>>, vector<1x256xf32>
    tpu.vector_store %arg5[%c1_31, %c768_32], %128 {strides = array<i32>} : memref<2x2048xf32, #tpu.memory_space<vmem>>, vector<1x256xf32>,
    %130 = vector.extract_strided_slice %105 {offsets = [4, 256], sizes = [1, 256], strides = [1, 1]} : vector<8x512xf32> to vector<1x256xf32>
    %c1_33 = arith.constant 1 : index
    %c1024_34 = arith.constant 1024 : index
    %131 = vector.load %arg5[%c1_33, %c1024_34] : memref<2x2048xf32, #tpu.memory_space<vmem>>, vector<1x256xf32>
    tpu.vector_store %arg5[%c1_33, %c1024_34], %130 {strides = array<i32>} : memref<2x2048xf32, #tpu.memory_space<vmem>>, vector<1x256xf32>,
    %132 = vector.extract_strided_slice %105 {offsets = [5, 256], sizes = [1, 256], strides = [1, 1]} : vector<8x512xf32> to vector<1x256xf32>
    %c1_35 = arith.constant 1 : index
    %c1280_36 = arith.constant 1280 : index
    %133 = vector.load %arg5[%c1_35, %c1280_36] : memref<2x2048xf32, #tpu.memory_space<vmem>>, vector<1x256xf32>
    tpu.vector_store %arg5[%c1_35, %c1280_36], %132 {strides = array<i32>} : memref<2x2048xf32, #tpu.memory_space<vmem>>, vector<1x256xf32>,
    %134 = vector.extract_strided_slice %105 {offsets = [6, 256], sizes = [1, 256], strides = [1, 1]} : vector<8x512xf32> to vector<1x256xf32>
    %c1_37 = arith.constant 1 : index
    %c1536_38 = arith.constant 1536 : index
    %135 = vector.load %arg5[%c1_37, %c1536_38] : memref<2x2048xf32, #tpu.memory_space<vmem>>, vector<1x256xf32>
    tpu.vector_store %arg5[%c1_37, %c1536_38], %134 {strides = array<i32>} : memref<2x2048xf32, #tpu.memory_space<vmem>>, vector<1x256xf32>,
    %136 = vector.extract_strided_slice %105 {offsets = [7, 256], sizes = [1, 256], strides = [1, 1]} : vector<8x512xf32> to vector<1x256xf32>
    %c1_39 = arith.constant 1 : index
    %c1792_40 = arith.constant 1792 : index
    %137 = vector.load %arg5[%c1_39, %c1792_40] : memref<2x2048xf32, #tpu.memory_space<vmem>>, vector<1x256xf32>
    tpu.vector_store %arg5[%c1_39, %c1792_40], %136 {strides = array<i32>} : memref<2x2048xf32, #tpu.memory_space<vmem>>, vector<1x256xf32>,
    %c0_41 = arith.constant 0 : index
    %c0_42 = arith.constant 0 : index
    %138 = vector.load %arg5[%c0_41, %c0_42] : memref<2x2048xf32, #tpu.memory_space<vmem>>, vector<2x2048xf32>
    %c0_43 = arith.constant 0 : index
    %c0_44 = arith.constant 0 : index
    %139 = vector.load %arg2[%c0_43, %c0_44] : memref<32x2048xf32, #tpu.memory_space<vmem>>, vector<32x2048xf32>
    %cst_45 = arith.constant dense<0.000000e+00> : vector<2x32xf32>
    %140 = tpu.matmul %138, %139, %cst_45 {dimension_numbers = #tpu.dot_dimension_numbers<[1], [1], [0], [0], [0, 0, 1, 0], [], []>} : vector<2x2048xf32>, vector<32x2048xf32>, vector<2x32xf32> -> vector<2x32xf32>
    %141 = vector.broadcast %8 : vector<1x32xf32> to vector<2x32xf32>
    %142 = arith.addf %140, %141 : vector<2x32xf32>
    %cst_46 = arith.constant 0.000000e+00 : f32
    %143 = vector.broadcast %cst_46 : f32 to vector<2x32xf32>
    %144 = arith.maximumf %142, %143 : vector<2x32xf32>
    %cst_47 = arith.constant dense<0.000000e+00> : vector<2x16xf32>
    %145 = tpu.matmul %144, %7, %cst_47 {dimension_numbers = #tpu.dot_dimension_numbers<[1], [0], [0], [1], [0, 0, 1, 1], [], []>} : vector<2x32xf32>, vector<32x16xf32>, vector<2x16xf32> -> vector<2x16xf32>
    %146 = vector.broadcast %9 : vector<1x16xf32> to vector<2x16xf32>
    %147 = arith.addf %145, %146 : vector<2x16xf32>
    %c0_48 = arith.constant 0 : index
    %c0_49 = arith.constant 0 : index
    %148 = vector.load %arg4[%c0_48, %c0_49] : memref<2x16xf32, #tpu.memory_space<vmem>>, vector<2x16xf32>
    tpu.vector_store %arg4[%c0_48, %c0_49], %147 {strides = array<i32>} : memref<2x16xf32, #tpu.memory_space<vmem>>, vector<2x16xf32>,
    return
  }
  func.func @transform_0(%arg0: i32) -> (i32, i32) {
    %c0_i32 = arith.constant 0 : i32
    %c0_i32_0 = arith.constant 0 : i32
    return %arg0, %c0_i32 : i32, i32
  }
  func.func @transform_1(%arg0: i32) -> (i32, i32) {
    %c0_i32 = arith.constant 0 : i32
    %c0_i32_0 = arith.constant 0 : i32
    %c0_i32_1 = arith.constant 0 : i32
    return %c0_i32, %c0_i32_0 : i32, i32
  }
  func.func @transform_2(%arg0: i32) -> (i32, i32) {
    %c0_i32 = arith.constant 0 : i32
    %c0_i32_0 = arith.constant 0 : i32
    %c0_i32_1 = arith.constant 0 : i32
    return %c0_i32, %c0_i32_0 : i32, i32
  }
  func.func @transform_3(%arg0: i32) -> (i32, i32) {
    %c0_i32 = arith.constant 0 : i32
    %c0_i32_0 = arith.constant 0 : i32
    return %arg0, %c0_i32 : i32, i32
  }
}

</mosaic_0001>

<bundles_post_ra>
// kernel: convqnet_forward.1
= control target key start
LH: loop header
LB: loop body
LE: loop exit
PB: predicated region body
PF: predicated region fallthrough
CT: control target
= control target key end

     0   :  { %8 = vsyncpa [#allocation4], 0  ;;  %s3348_s0 = inlined_call_operand.vmem [shape: f32[16,358], index: 0, kind: input, shape index: {}]   ;;  %s3349_s1 = inlined_call_operand.hbm [shape: f32[32,2048], index: 1, kind: input, shape index: {}]   ;;  %s3350_s2 = inlined_call_operand.vmem [shape: f32[96,128], index: 2, kind: input, shape index: {}]   ;;  %s3351_s3 = inlined_call_operand.hbm [shape: f32[2,16], index: 3, kind: output, shape index: {}]  }
   0x1   :  { %9 = vsyncpa [#allocation5], 0  ;;  %s2531_s12 = smov [#allocation3]  }
   0x2   :  { %s17_s13 = sshll.u32 %s2531_s12, 4  ;;  %s18_s13 = int_to_ptr.vmem [resolvable:$true] %s17_s13 }
   0x3   :  { %s2495_s14 = scalar_lea.vmem %s18_s13, 8192  ;;  %p2500_p1 = scmp.lt.s32.totalorder %s18_s13, %s18_s13 }
   0x4   :  { %p2496_p0 = scmp.ne.s32.totalorder %s18_s13, %s2495_s14  ;;  %p2501_p2 = scmp.lt.s32.totalorder %s2495_s14, %s2495_s14 }
   0x6   :  { %p2502_p3 = por %p2501_p2, %p2500_p1 }
   0x8   :  { %p2503_p4 = pnand %p2502_p3, %p2496_p0 }
   0xa   :  { %2506 = shalt.err (!%p2503_p4)
}
   0xb   :  { %s2532_s15 = smov 2048   ;;  %s2533_s16 = smov 128  }
   0xc   :  { %23 = dma.hbm_to_vmem [thread:$0]  %s3349_s1, 8192, %s18_s13, [#allocation4], %s2532_s15, %s2532_s15, %s2533_s16  }
   0xd   :  { %2527 = dma.done.wait [#allocation4], 8192  }
   0xe   :  { %2528 = vsyncadd [#allocation4], 4294959104  ;;  %v2575_v0 = vld [vmem:[%s3348_s0 + $0x28] sm:$0xff]  ;;  %v2580_v1 = vld [vmem:[%s3348_s0 + $0x18] sm:$0xff]  ;;  %s2534_s23 = smov 94   ;;  %s2535_s25 = smov 95  }
   0xf   :  { %209 = vrot.lane.b32.xlu1 %v2575_v0, %s2534_s23  ;;  %205 = vrot.lane.b32.xlu0 %v2580_v1, %s2534_s23  ;;  %v2589_v2 = vld [vmem:[%s3348_s0 + $0x20] sm:$0xff]  ;;  %s2536_s26 = smov 96   ;;  %s2537_s27 = smov 110   ;;  %v2638_v3 = vld [vmem:[%s3348_s0 + $0x8] sm:$0xff]  ;;  %v2543_v14 = vmov 0.0   ;;  %vm140_vm0 = vcmask 769024  }
  0x10   :  { %s2538_s28 = smov 111   ;;  %s2539_s29 = smov 112   ;;  %v2643_v4 = vld [vmem:[%s3348_s0 + $0x10] sm:$0xff]  ;;  %v2652_v5 = vld [vmem:[%s3348_s0] sm:$0xff]  ;;  %404 = vmatprep.mubr.f32.mxu0 %v2543_v14  ;;  %475 = vmatprep.mubr.f32.mxu1 %v2543_v14  ;;  %vm128_vm1 = vcmask 777216   ;;  %vm116_vm2 = vcmask 785408  }
  0x11   :  { %s2540_s30 = smov 126   ;;  %s2541_s4 = smov 127   ;;  %vm104_vm3 = vcmask 900096   ;;  %vm92_vm4 = vcmask 908288   ;;  %vm80_vm5 = vcmask 916480   ;;  %vm68_vm6 = vcmask 1031168  }
  0x12   :  { %s2542_s0 = smov 68   ;;  %vm56_vm7 = vcmask 1039360   ;;  %v2544_v60 = vmov 0   ;;  %vm336_vm8 = vcmask 588800   ;;  %vm267_vm9 = vcmask 556032   ;;  %s2548_s7 = smov [#allocation6]  }
  0x13   :  { %197 = vrot.lane.b32.xlu1 %v2580_v1, %s2535_s25  ;;  %207 = vrot.lane.b32.xlu0 %v2589_v2, %s2534_s23  ;;  %vm2545_vm10 = vmmov 0   ;;  %vm801_vm11 = vcmask 277504   ;;  %s2396_s8 = sshll.u32 %s2548_s7, 4  ;;  %s2397_s8 = int_to_ptr.vmem [resolvable:$true] %s2396_s8 }
  0x14   :  { %2481 = vset.pattern.permute.xlu1 %v2544_v60  ;;  %2482 = vset.pattern.permute.xlu0 %v2544_v60  ;;  %s2507_s9 = scalar_lea.vmem %s2397_s8, 32  ;;  %p2512_p6 = scmp.lt.s32.totalorder %s2397_s8, %s2397_s8 }
  0x15   :  { %p2508_p5 = scmp.ne.s32.totalorder %s2397_s8, %s2507_s9  ;;  %p2513_p7 = scmp.lt.s32.totalorder %s2507_s9, %s2507_s9 }
  0x17   :  { %201 = vrot.lane.b32.xlu1 %v2575_v0, %s2535_s25  ;;  %199 = vrot.lane.b32.xlu0 %v2589_v2, %s2535_s25  ;;  %p2514_p8 = por %p2513_p7, %p2512_p6 }
  0x19   :  { %p2515_p9 = pnand %p2514_p8, %p2508_p5 }
  0x1b   :  { %191 = vrot.lane.b32.xlu1 %v2589_v2, %s2536_s26  ;;  %189 = vrot.lane.b32.xlu0 %v2580_v1, %s2536_s26 }
  0x1f   :  { %181 = vrot.lane.b32.xlu1 %v2580_v1, %s2537_s27  ;;  %193 = vrot.lane.b32.xlu0 %v2575_v0, %s2536_s26 }
  0x23   :  { %185 = vrot.lane.b32.xlu1 %v2575_v0, %s2537_s27  ;;  %183 = vrot.lane.b32.xlu0 %v2589_v2, %s2537_s27 }
  0x27   :  { %175 = vrot.lane.b32.xlu1 %v2589_v2, %s2538_s28  ;;  %173 = vrot.lane.b32.xlu0 %v2580_v1, %s2538_s28 }
  0x2b   :  { %177 = vrot.lane.b32.xlu0 %v2575_v0, %s2538_s28  ;;  %165 = vrot.lane.b32.xlu1 %v2580_v1, %s2539_s29 }
  0x2f   :  { %167 = vrot.lane.b32.xlu0 %v2589_v2, %s2539_s29  ;;  %169 = vrot.lane.b32.xlu1 %v2575_v0, %s2539_s29 }
  0x33   :  { %157 = vrot.lane.b32.xlu0 %v2580_v1, %s2540_s30  ;;  %159 = vrot.lane.b32.xlu1 %v2589_v2, %s2540_s30 }
  0x37   :  { %161 = vrot.lane.b32.xlu0 %v2575_v0, %s2540_s30  ;;  %149 = vrot.lane.b32.xlu1 %v2580_v1, %s2541_s4 }
  0x3b   :  { %151 = vrot.lane.b32.xlu0 %v2589_v2, %s2541_s4  ;;  %153 = vrot.lane.b32.xlu1 %v2575_v0, %s2541_s4 }
  0x3f   :  { %136 = vrot.lane.b32.xlu0 %v2638_v3, %s2534_s23  ;;  %138 = vrot.lane.b32.xlu1 %v2643_v4, %s2534_s23 }
  0x43   :  { %134 = vrot.lane.b32.xlu0 %v2652_v5, %s2534_s23  ;;  %124 = vrot.lane.b32.xlu1 %v2638_v3, %s2535_s25 }
  0x47   :  { %126 = vrot.lane.b32.xlu0 %v2643_v4, %s2535_s25  ;;  %122 = vrot.lane.b32.xlu1 %v2652_v5, %s2535_s25 }
  0x4b   :  { %112 = vrot.lane.b32.xlu0 %v2638_v3, %s2536_s26  ;;  %114 = vrot.lane.b32.xlu1 %v2643_v4, %s2536_s26 }
  0x4f   :  { %110 = vrot.lane.b32.xlu0 %v2652_v5, %s2536_s26  ;;  %100 = vrot.lane.b32.xlu1 %v2638_v3, %s2537_s27 }
  0x53   :  { %102 = vrot.lane.b32.xlu0 %v2643_v4, %s2537_s27  ;;  %98 = vrot.lane.b32.xlu1 %v2652_v5, %s2537_s27 }
  0x57   :  { %88 = vrot.lane.b32.xlu0 %v2638_v3, %s2538_s28  ;;  %90 = vrot.lane.b32.xlu1 %v2643_v4, %s2538_s28 }
  0x5b   :  { %86 = vrot.lane.b32.xlu0 %v2652_v5, %s2538_s28  ;;  %76 = vrot.lane.b32.xlu1 %v2638_v3, %s2539_s29 }
  0x5f   :  { %78 = vrot.lane.b32.xlu0 %v2643_v4, %s2539_s29  ;;  %74 = vrot.lane.b32.xlu1 %v2652_v5, %s2539_s29 }
  0x63   :  { %64 = vrot.lane.b32.xlu0 %v2638_v3, %s2540_s30  ;;  %66 = vrot.lane.b32.xlu1 %v2643_v4, %s2540_s30 }
  0x67   :  { %62 = vrot.lane.b32.xlu0 %v2652_v5, %s2540_s30  ;;  %52 = vrot.lane.b32.xlu1 %v2638_v3, %s2541_s4 }
  0x6b   :  { %54 = vrot.lane.b32.xlu0 %v2643_v4, %s2541_s4  ;;  %50 = vrot.lane.b32.xlu1 %v2652_v5, %s2541_s4 }
  0x81   :  { %v210_v6 = vpop.permute.xlu1 %209  ;;  %v206_v7 = vpop.permute.xlu0 %205 }
  0x82   :  { %265 = vrot.lane.b32.xlu0 %v210_v6, %s2542_s0 }
  0x85   :  { %v198_v8 = vpop.permute.xlu1 %197  ;;  %v208_v9 = vpop.permute.xlu0 %207 }
  0x86   :  { %v212_v21 = vsel %vm140_vm0, %v208_v9, %v210_v6  ;;  %v211_v26 = vsel %vm140_vm0, %v206_v7, %v208_v9  ;;  %v38_v6 = vld [vmem:[%s3350_s2 + $0x18] sm:$0xff] }
  0x89   :  { %v202_v10 = vpop.permute.xlu1 %201  ;;  %v200_v11 = vpop.permute.xlu0 %199 }
  0x8a   :  { %259 = vrot.lane.b32.xlu1 %v202_v10, %s2542_s0  ;;  %v203_v23 = vsel %vm128_vm1, %v198_v8, %v200_v11  ;;  %v204_v30 = vsel %vm128_vm1, %v200_v11, %v202_v10 }
  0x8d   :  { %v192_v12 = vpop.permute.xlu1 %191  ;;  %v190_v13 = vpop.permute.xlu0 %189 }
  0x8e   :  { %v195_v34 = vsel %vm116_vm2, %v190_v13, %v192_v12 }
  0x91   :  { %v182_v15 = vpop.permute.xlu1 %181  ;;  %v194_v16 = vpop.permute.xlu0 %193 }
  0x92   :  { %253 = vrot.lane.b32.xlu0 %v194_v16, %s2542_s0  ;;  %v196_v25 = vsel %vm116_vm2, %v192_v12, %v194_v16 }
  0x95   :  { %v186_v17 = vpop.permute.xlu1 %185  ;;  %v184_v18 = vpop.permute.xlu0 %183 }
  0x96   :  { %247 = vrot.lane.b32.xlu1 %v186_v17, %s2542_s0  ;;  %v187_v29 = vsel %vm104_vm3, %v182_v15, %v184_v18  ;;  %v188_v38 = vsel %vm104_vm3, %v184_v18, %v186_v17 }
  0x99   :  { %v176_v19 = vpop.permute.xlu1 %175  ;;  %v174_v20 = vpop.permute.xlu0 %173 }
  0x9a   :  { %263 = vrot.lane.b32.xlu1 %v212_v21, %s2542_s0  ;;  %v179_v41 = vsel %vm92_vm4, %v174_v20, %v176_v19 }
  0x9d   :  { %v178_v22 = vpop.permute.xlu0 %177  ;;  %v166_v24 = vpop.permute.xlu1 %165 }
  0x9e   :  { %255 = vrot.lane.b32.xlu1 %v203_v23, %s2542_s0  ;;  %241 = vrot.lane.b32.xlu0 %v178_v22, %s2542_s0  ;;  %v180_v33 = vsel %vm92_vm4, %v176_v19, %v178_v22 }
  0xa1   :  { %v168_v27 = vpop.permute.xlu0 %167  ;;  %v170_v28 = vpop.permute.xlu1 %169 }
  0xa2   :  { %251 = vrot.lane.b32.xlu1 %v196_v25, %s2542_s0  ;;  %261 = vrot.lane.b32.xlu0 %v211_v26, %s2542_s0  ;;  %v171_v37 = vsel %vm80_vm5, %v166_v24, %v168_v27  ;;  %v172_v46 = vsel %vm80_vm5, %v168_v27, %v170_v28 }
  0xa5   :  { %v158_v31 = vpop.permute.xlu0 %157  ;;  %v160_v32 = vpop.permute.xlu1 %159 }
  0xa6   :  { %243 = vrot.lane.b32.xlu1 %v187_v29, %s2542_s0  ;;  %257 = vrot.lane.b32.xlu0 %v204_v30, %s2542_s0  ;;  %v163_v51 = vsel %vm68_vm6, %v158_v31, %v160_v32  ;;  %v2792_v29 = vld [vmem:[%s3350_s2] sm:$0xff] }
  0xa9   :  { %v162_v35 = vpop.permute.xlu0 %161  ;;  %v150_v36 = vpop.permute.xlu1 %149 }
  0xaa   :  { %239 = vrot.lane.b32.xlu1 %v180_v33, %s2542_s0  ;;  %249 = vrot.lane.b32.xlu0 %v195_v34, %s2542_s0  ;;  %v164_v45 = vsel %vm68_vm6, %v160_v32, %v162_v35 }
  0xad   :  { %v152_v39 = vpop.permute.xlu0 %151  ;;  %v154_v40 = vpop.permute.xlu1 %153 }
  0xae   :  { %231 = vrot.lane.b32.xlu1 %v171_v37, %s2542_s0  ;;  %245 = vrot.lane.b32.xlu0 %v188_v38, %s2542_s0  ;;  %v155_v50 = vsel %vm56_vm7, %v150_v36, %v152_v39  ;;  %v156_v59 = vsel %vm56_vm7, %v152_v39, %v154_v40 }
  0xb1   :  { %v137_v42 = vpop.permute.xlu0 %136  ;;  %v2726_v43 = vpop.permute.xlu1 %138 }
  0xb2   :  { %235 = vrot.lane.b32.xlu1 %v170_v28, %s2542_s0  ;;  %237 = vrot.lane.b32.xlu0 %v179_v41, %s2542_s0  ;;  %v142_v44 = vsel %vm140_vm0, %v137_v42, %v2726_v43 }
  0xb3   :  { %354 = vmatprep.subr.mxu0 %v142_v44 }
  0xb5   :  { %v135_v47 = vpop.permute.xlu0 %134  ;;  %v125_v48 = vpop.permute.xlu1 %124 }
  0xb6   :  { %227 = vrot.lane.b32.xlu1 %v164_v45, %s2542_s0  ;;  %233 = vrot.lane.b32.xlu0 %v172_v46, %s2542_s0  ;;  %v141_v49 = vsel %vm140_vm0, %v135_v47, %v137_v42 }
  0xb7   :  { %355 = vmatpush1.msra.mxu0 %v141_v49 }
  0xb9   :  { %v2739_v52 = vpop.permute.xlu0 %126  ;;  %v123_v53 = vpop.permute.xlu1 %122 }
  0xba   :  { %219 = vrot.lane.b32.xlu1 %v155_v50, %s2542_s0  ;;  %225 = vrot.lane.b32.xlu0 %v163_v51, %s2542_s0  ;;  %v130_v54 = vsel %vm128_vm1, %v125_v48, %v2739_v52  ;;  %v129_v55 = vsel %vm128_vm1, %v123_v53, %v125_v48 }
  0xbb   :  { %356 = vmatprep.subr.mxu0 %v130_v54 }
  0xbc   :  { %357 = vmatpush1.msra.mxu0 %v129_v55 }
  0xbd   :  { %v113_v56 = vpop.permute.xlu0 %112  ;;  %v2746_v57 = vpop.permute.xlu1 %114 }
  0xbe   :  { %229 = vrot.lane.b32.xlu0 %v162_v35, %s2542_s0  ;;  %223 = vrot.lane.b32.xlu1 %v154_v40, %s2542_s0  ;;  %v118_v58 = vsel %vm116_vm2, %v113_v56, %v2746_v57 }
  0xbf   :  { %358 = vmatprep.subr.mxu0 %v118_v58 }
  0xc1   :  { %v111_v61 = vpop.permute.xlu0 %110  ;;  %v101_v62 = vpop.permute.xlu1 %100 }
  0xc2   :  { %221 = vrot.lane.b32.xlu0 %v156_v59, %s2542_s0  ;;  %215 = vrot.lane.b32.xlu1 %v2589_v2, %s2542_s0  ;;  %v117_v63 = vsel %vm116_vm2, %v111_v61, %v113_v56 }
  0xc3   :  { %359 = vmatpush1.msra.mxu0 %v117_v63 }
  0xc5   :  { %v2760_v7 = vpop.permute.xlu0 %102  ;;  %v99_v8 = vpop.permute.xlu1 %98 }
  0xc6   :  { %213 = vrot.lane.b32.xlu0 %v2580_v1, %s2542_s0  ;;  %v106_v9 = vsel %vm104_vm3, %v101_v62, %v2760_v7  ;;  %v105_v10 = vsel %vm104_vm3, %v99_v8, %v101_v62  ;;  %333 = vperm.xlu1 %2481, %v38_v6  }
  0xc7   :  { %360 = vmatprep.subr.mxu0 %v106_v9 }
  0xc8   :  { %361 = vmatpush1.msra.mxu0 %v105_v10 }
  0xc9   :  { %v89_v2 = vpop.permute.xlu0 %88  ;;  %v2767_v11 = vpop.permute.xlu1 %90 }
  0xca   :  { %217 = vrot.lane.b32.xlu0 %v2575_v0, %s2542_s0  ;;  %v94_v12 = vsel %vm92_vm4, %v89_v2, %v2767_v11 }
  0xcb   :  { %362 = vmatprep.subr.mxu0 %v94_v12 }
  0xcd   :  { %v87_v13 = vpop.permute.xlu0 %86  ;;  %v77_v1 = vpop.permute.xlu1 %76 }
  0xce   :  { %v93_v15 = vsel %vm92_vm4, %v87_v13, %v89_v2 }
  0xcf   :  { %363 = vmatpush1.msra.mxu0 %v93_v15 }
  0xd1   :  { %v2774_v16 = vpop.permute.xlu0 %78  ;;  %v75_v17 = vpop.permute.xlu1 %74 }
  0xd2   :  { %v82_v18 = vsel %vm80_vm5, %v77_v1, %v2774_v16  ;;  %v81_v19 = vsel %vm80_vm5, %v75_v17, %v77_v1 }
  0xd3   :  { %364 = vmatprep.subr.mxu0 %v82_v18 }
  0xd4   :  { %365 = vmatpush1.msra.mxu0 %v81_v19 }
  0xd5   :  { %v65_v0 = vpop.permute.xlu0 %64  ;;  %v2779_v20 = vpop.permute.xlu1 %66 }
  0xd6   :  { %v70_v21 = vsel %vm68_vm6, %v65_v0, %v2779_v20 }
  0xd7   :  { %366 = vmatprep.subr.mxu0 %v70_v21 }
  0xd9   :  { %v63_v22 = vpop.permute.xlu0 %62  ;;  %v53_v23 = vpop.permute.xlu1 %52 }
  0xda   :  { %v69_v24 = vsel %vm68_vm6, %v63_v22, %v65_v0 }
  0xdb   :  { %367 = vmatpush1.msra.mxu0 %v69_v24 }
  0xdd   :  { %v2784_v25 = vpop.permute.xlu0 %54  ;;  %v51_v26 = vpop.permute.xlu1 %50 }
  0xde   :  { %v58_v27 = vsel %vm56_vm7, %v53_v23, %v2784_v25  ;;  %v57_v28 = vsel %vm56_vm7, %v51_v26, %v53_v23 }
  0xdf   :  { %368 = vmatprep.subr.mxu0 %v58_v27 }
  0xe0   :  { %369 = vmatpush1.msra.mxu0 %v57_v28 }
  0xe1   :  { %370 = vmatprep.subr.mxu0 %v2638_v3 }
  0xe2   :  { %371 = vmatpush1.msra.mxu0 %v2652_v5 }
  0xe3   :  { %2405 = vmatmul.mubr.msk.f32.vlgmr.msra.gmra.mxu0 %vm336_vm8, %v2792_v29 }
  0xe4   :  { %546 = vmatprep.mubr.f32.mxu0 %v2543_v14 }
  0xf4   :  { %v266_v30 = vpop.permute.xlu0 %265 }
  0xf5   :  { %496 = vmatprep.subr.mxu0 %v266_v30 }
  0xfc   :  { %v260_v31 = vpop.permute.xlu1 %259 }
 0x104   :  { %v254_v33 = vpop.permute.xlu0 %253 }
 0x108   :  { %v248_v32 = vpop.permute.xlu1 %247 }
 0x10c   :  { %v264_v34 = vpop.permute.xlu1 %263 }
 0x10d   :  { %v285_v35 = vsel %vm267_vm9, %v264_v34, %v266_v30 }
 0x10e   :  { %497 = vmatpush1.msra.mxu0 %v285_v35 }
 0x10f   :  { %498 = vmatprep.subr.mxu0 %v260_v31 }
 0x110   :  { %v256_v36 = vpop.permute.xlu1 %255  ;;  %v242_v3 = vpop.permute.xlu0 %241 }
 0x111   :  { %v329_v45 = vsel %vm267_vm9, %v2739_v52, %v256_v36 }
 0x114   :  { %v252_v37 = vpop.permute.xlu1 %251  ;;  %v262_v5 = vpop.permute.xlu0 %261 }
 0x115   :  { %v284_v38 = vsel %vm267_vm9, %v262_v5, %v264_v34  ;;  %v330_v39 = vsel %vm267_vm9, %v2726_v43, %v262_v5  ;;  %v281_v46 = vsel %vm267_vm9, %v252_v37, %v254_v33 }
 0x116   :  { %425 = vmatprep.subr.mxu1 %v284_v38 }
 0x117   :  { %426 = vmatpush1.msra.mxu1 %v330_v39 }
 0x118   :  { %v244_v40 = vpop.permute.xlu1 %243  ;;  %v258_v41 = vpop.permute.xlu0 %257 }
 0x119   :  { %v282_v42 = vsel %vm267_vm9, %v256_v36, %v258_v41  ;;  %v283_v44 = vsel %vm267_vm9, %v258_v41, %v260_v31  ;;  %v327_v54 = vsel %vm267_vm9, %v2760_v7, %v244_v40 }
 0x11a   :  { %427 = vmatprep.subr.mxu1 %v282_v42  ;;  %499 = vmatpush1.msra.mxu0 %v283_v44 }
 0x11b   :  { %428 = vmatpush1.msra.mxu1 %v329_v45  ;;  %500 = vmatprep.subr.mxu0 %v254_v33 }
 0x11c   :  { %v240_v47 = vpop.permute.xlu1 %239  ;;  %501 = vmatpush1.msra.mxu0 %v281_v46  ;;  %v250_v43 = vpop.permute.xlu0 %249 }
 0x11d   :  { %502 = vmatprep.subr.mxu0 %v248_v32  ;;  %v280_v48 = vsel %vm267_vm9, %v250_v43, %v252_v37  ;;  %v328_v49 = vsel %vm267_vm9, %v2746_v57, %v250_v43  ;;  %v277_v55 = vsel %vm267_vm9, %v240_v47, %v242_v3 }
 0x11e   :  { %429 = vmatprep.subr.mxu1 %v280_v48 }
 0x11f   :  { %430 = vmatpush1.msra.mxu1 %v328_v49 }
 0x120   :  { %v232_v50 = vpop.permute.xlu1 %231  ;;  %v246_v51 = vpop.permute.xlu0 %245 }
 0x121   :  { %v278_v53 = vsel %vm267_vm9, %v244_v40, %v246_v51  ;;  %v279_v52 = vsel %vm267_vm9, %v246_v51, %v248_v32  ;;  %v325_v6 = vsel %vm267_vm9, %v2774_v16, %v232_v50 }
 0x122   :  { %431 = vmatprep.subr.mxu1 %v278_v53  ;;  %503 = vmatpush1.msra.mxu0 %v279_v52 }
 0x123   :  { %432 = vmatpush1.msra.mxu1 %v327_v54  ;;  %504 = vmatprep.subr.mxu0 %v242_v3 }
 0x124   :  { %v236_v56 = vpop.permute.xlu1 %235  ;;  %505 = vmatpush1.msra.mxu0 %v277_v55  ;;  %v238_v57 = vpop.permute.xlu0 %237 }
 0x125   :  { %v276_v58 = vsel %vm267_vm9, %v238_v57, %v240_v47  ;;  %v326_v59 = vsel %vm267_vm9, %v2767_v11, %v238_v57  ;;  %506 = vmatprep.subr.mxu0 %v236_v56 }
 0x126   :  { %433 = vmatprep.subr.mxu1 %v276_v58 }
 0x127   :  { %434 = vmatpush1.msra.mxu1 %v326_v59 }
 0x128   :  { %v228_v60 = vpop.permute.xlu1 %227  ;;  %v234_v61 = vpop.permute.xlu0 %233 }
 0x129   :  { %v274_v62 = vsel %vm267_vm9, %v232_v50, %v234_v61  ;;  %v275_v63 = vsel %vm267_vm9, %v234_v61, %v236_v56 }
 0x12a   :  { %435 = vmatprep.subr.mxu1 %v274_v62  ;;  %507 = vmatpush1.msra.mxu0 %v275_v63 }
 0x12b   :  { %436 = vmatpush1.msra.mxu1 %v325_v6 }
 0x12c   :  { %v220_v7 = vpop.permute.xlu1 %219  ;;  %v226_v8 = vpop.permute.xlu0 %225 }
 0x12d   :  { %v272_v9 = vsel %vm267_vm9, %v226_v8, %v228_v60  ;;  %v324_v10 = vsel %vm267_vm9, %v2779_v20, %v226_v8  ;;  %v323_v16 = vsel %vm267_vm9, %v2784_v25, %v220_v7 }
 0x12e   :  { %437 = vmatprep.subr.mxu1 %v272_v9 }
 0x12f   :  { %438 = vmatpush1.msra.mxu1 %v324_v10 }
 0x130   :  { %v230_v2 = vpop.permute.xlu0 %229  ;;  %v224_v11 = vpop.permute.xlu1 %223 }
 0x131   :  { %508 = vmatprep.subr.mxu0 %v230_v2  ;;  %v273_v12 = vsel %vm267_vm9, %v228_v60, %v230_v2 }
 0x132   :  { %509 = vmatpush1.msra.mxu0 %v273_v12 }
 0x133   :  { %510 = vmatprep.subr.mxu0 %v224_v11 }
 0x134   :  { %v222_v13 = vpop.permute.xlu0 %221  ;;  %v216_v17 = vpop.permute.xlu1 %215 }
 0x135   :  { %v270_v1 = vsel %vm267_vm9, %v220_v7, %v222_v13  ;;  %v271_v15 = vsel %vm267_vm9, %v222_v13, %v224_v11 }
 0x136   :  { %439 = vmatprep.subr.mxu1 %v270_v1  ;;  %511 = vmatpush1.msra.mxu0 %v271_v15 }
 0x137   :  { %440 = vmatpush1.msra.mxu1 %v323_v16 }
 0x138   :  { %v214_v18 = vpop.permute.xlu0 %213 }
 0x139   :  { %v268_v19 = vsel %vm267_vm9, %v214_v18, %v216_v17  ;;  %v322_v0 = vsel %vm267_vm9, %v2643_v4, %v214_v18 }
 0x13a   :  { %441 = vmatprep.subr.mxu1 %v268_v19 }
 0x13b   :  { %442 = vmatpush1.msra.mxu1 %v322_v0 }
 0x13c   :  { %2406 = vmatmul.mubr.msk.f32.vlgmr.msra.gmra.mxu1 %vm336_vm8, %v2792_v29  ;;  %v218_v20 = vpop.permute.xlu0 %217 }
 0x13d   :  { %512 = vmatprep.subr.mxu0 %v218_v20  ;;  %v269_v21 = vsel %vm267_vm9, %v216_v17, %v218_v20  ;;  %883 = vmatprep.mubr.f32.mxu1 %v2543_v14 }
 0x13e   :  { %513 = vmatpush1.msra.mxu0 %v269_v21 }
 0x13f   :  { %2407 = vmatmul.mubr.msk.f32.vlgmr.msra.gmra.mxu0 %vm336_vm8, %v2792_v29 }
 0x140   :  { %954 = vmatprep.mubr.f32.mxu0 %v2543_v14 }
 0x141   :  { %v334_v23 = vpop.permute.xlu1 %333 }
 0x1a3   :  { %v406_v22 = vpop.f32.mrf.mxu0 }
 0x1a4   :  { %v407_v4 = vadd.f32 %v406_v22, %v334_v23 }
 0x1a5   :  { %v408_v24 = vpop.f32.mrf.mxu0 }
 0x1a6   :  { %v2841_v25 = vmax.f32 %v407_v4, 0.0  ;;  %v409_v26 = vadd.f32 %v408_v24, %v334_v23 }
 0x1a8   :  { %v2843_v27 = vmax.f32 %v409_v26, 0.0  ;;  %639 = vrot.lane.b32.xlu0 %v2841_v25, %s2534_s23 }
 0x1aa   :  { %641 = vrot.lane.b32.xlu1 %v2843_v27, %s2534_s23 }
 0x1ac   :  { %628 = vrot.lane.b32.xlu0 %v2841_v25, %s2535_s25 }
 0x1ae   :  { %630 = vrot.lane.b32.xlu1 %v2843_v27, %s2535_s25 }
 0x1b0   :  { %617 = vrot.lane.b32.xlu0 %v2841_v25, %s2536_s26 }
 0x1b2   :  { %619 = vrot.lane.b32.xlu1 %v2843_v27, %s2536_s26 }
 0x1b4   :  { %606 = vrot.lane.b32.xlu0 %v2841_v25, %s2537_s27 }
 0x1b6   :  { %608 = vrot.lane.b32.xlu1 %v2843_v27, %s2537_s27 }
 0x1ba   :  { %597 = vrot.lane.b32.xlu1 %v2843_v27, %s2538_s28 }
 0x1fc   :  { %v477_v31 = vpop.f32.mrf.mxu1 }
 0x1fd   :  { %v478_v32 = vadd.f32 %v477_v31, %v334_v23 }
 0x1fe   :  { %v479_v3 = vpop.f32.mrf.mxu1 }
 0x1ff   :  { %v548_v28 = vpop.f32.mrf.mxu0  ;;  %v2867_v33 = vmax.f32 %v478_v32, 0.0  ;;  %v480_v37 = vadd.f32 %v479_v3, %v334_v23 }
 0x200   :  { %v549_v29 = vadd.f32 %v548_v28, %v334_v23 }
 0x201   :  { %v550_v34 = vpop.f32.mrf.mxu0  ;;  %v556_v5 = vmax.f32 %v480_v37, 0.0 }
 0x202   :  { %v557_v30 = vmax.f32 %v549_v29, 0.0  ;;  %v551_v35 = vadd.f32 %v550_v34, %v334_v23 }
 0x204   :  { %672 = vrot.lane.b32.xlu1 %v557_v30, %s2538_s28  ;;  %703 = vrot.lane.b32.xlu0 %v557_v30, %s2534_s23  ;;  %v558_v36 = vmax.f32 %v551_v35, 0.0 }
 0x208   :  { %660 = vrot.lane.b32.xlu1 %v557_v30, %s2540_s30  ;;  %694 = vrot.lane.b32.xlu0 %v557_v30, %s2535_s25 }
 0x20c   :  { %599 = vrot.lane.b32.xlu1 %v2867_v33, %s2538_s28  ;;  %685 = vrot.lane.b32.xlu0 %v557_v30, %s2536_s26 }
 0x210   :  { %577 = vrot.lane.b32.xlu1 %v2867_v33, %s2540_s30  ;;  %678 = vrot.lane.b32.xlu0 %v557_v30, %s2537_s27 }
 0x214   :  { %705 = vrot.lane.b32.xlu1 %v558_v36, %s2534_s23  ;;  %666 = vrot.lane.b32.xlu0 %v557_v30, %s2539_s29 }
 0x218   :  { %696 = vrot.lane.b32.xlu1 %v558_v36, %s2535_s25  ;;  %654 = vrot.lane.b32.xlu0 %v557_v30, %s2541_s4 }
 0x21a   :  { %v640_v40 = vpop.permute.xlu0 %639 }
 0x21c   :  { %687 = vrot.lane.b32.xlu1 %v558_v36, %s2536_s26  ;;  %643 = vrot.lane.b32.xlu0 %v2867_v33, %s2534_s23  ;;  %v642_v38 = vpop.permute.xlu1 %641 }
 0x21d   :  { %v645_v7 = vsel %vm140_vm0, %v640_v40, %v642_v38 }
 0x21e   :  { %v629_v42 = vpop.permute.xlu0 %628 }
 0x220   :  { %701 = vrot.lane.b32.xlu1 %v556_v5, %s2534_s23  ;;  %632 = vrot.lane.b32.xlu0 %v2867_v33, %s2535_s25  ;;  %v631_v39 = vpop.permute.xlu1 %630 }
 0x221   :  { %v634_v12 = vsel %vm128_vm1, %v629_v42, %v631_v39 }
 0x222   :  { %v618_v45 = vpop.permute.xlu0 %617 }
 0x224   :  { %692 = vrot.lane.b32.xlu1 %v556_v5, %s2535_s25  ;;  %621 = vrot.lane.b32.xlu0 %v2867_v33, %s2536_s26  ;;  %v620_v41 = vpop.permute.xlu1 %619 }
 0x225   :  { %v623_v18 = vsel %vm116_vm2, %v618_v45, %v620_v41 }
 0x226   :  { %v607_v47 = vpop.permute.xlu0 %606 }
 0x228   :  { %683 = vrot.lane.b32.xlu1 %v556_v5, %s2536_s26  ;;  %610 = vrot.lane.b32.xlu0 %v2867_v33, %s2537_s27  ;;  %v609_v44 = vpop.permute.xlu1 %608 }
 0x229   :  { %v612_v23 = vsel %vm104_vm3, %v607_v47, %v609_v44 }
 0x22c   :  { %676 = vrot.lane.b32.xlu1 %v556_v5, %s2537_s27  ;;  %588 = vrot.lane.b32.xlu0 %v2867_v33, %s2539_s29  ;;  %v2914_v46 = vpop.permute.xlu1 %597 }
 0x230   :  { %664 = vrot.lane.b32.xlu1 %v556_v5, %s2539_s29  ;;  %566 = vrot.lane.b32.xlu0 %v2867_v33, %s2541_s4 }
 0x234   :  { %652 = vrot.lane.b32.xlu1 %v556_v5, %s2541_s4  ;;  %670 = vrot.lane.b32.xlu0 %v556_v5, %s2538_s28 }
 0x238   :  { %586 = vrot.lane.b32.xlu1 %v2843_v27, %s2539_s29  ;;  %658 = vrot.lane.b32.xlu0 %v556_v5, %s2540_s30 }
 0x23c   :  { %575 = vrot.lane.b32.xlu1 %v2843_v27, %s2540_s30  ;;  %595 = vrot.lane.b32.xlu0 %v2841_v25, %s2538_s28 }
 0x240   :  { %564 = vrot.lane.b32.xlu1 %v2843_v27, %s2541_s4  ;;  %584 = vrot.lane.b32.xlu0 %v2841_v25, %s2539_s29 }
 0x244   :  { %573 = vrot.lane.b32.xlu0 %v2841_v25, %s2540_s30 }
 0x248   :  { %562 = vrot.lane.b32.xlu0 %v2841_v25, %s2541_s4 }
 0x276   :  { %v2916_v43 = vpop.permute.xlu1 %672  ;;  %v2918_v48 = vpop.permute.xlu0 %703 }
 0x277   :  { %732 = vrot.lane.b32.xlu1 %v2916_v43, %s2534_s23 }
 0x27a   :  { %v2922_v49 = vpop.permute.xlu1 %660  ;;  %v695_v50 = vpop.permute.xlu0 %694 }
 0x27b   :  { %720 = vrot.lane.b32.xlu1 %v2922_v49, %s2534_s23 }
 0x27e   :  { %v2926_v51 = vpop.permute.xlu1 %599  ;;  %v686_v53 = vpop.permute.xlu0 %685 }
 0x27f   :  { %v602_v24 = vsel %vm92_vm4, %v2914_v46, %v2926_v51 }
 0x282   :  { %v2928_v52 = vpop.permute.xlu1 %577  ;;  %v679_v54 = vpop.permute.xlu0 %678 }
 0x283   :  { %738 = vrot.lane.b32.xlu0 %v679_v54, %s2534_s23 }
 0x286   :  { %v706_v55 = vpop.permute.xlu1 %705  ;;  %v2931_v56 = vpop.permute.xlu0 %666 }
 0x287   :  { %v709_v57 = vsel %vm140_vm0, %v2918_v48, %v706_v55  ;;  %726 = vrot.lane.b32.xlu0 %v2931_v56, %s2534_s23 }
 0x288   :  { %756 = vrot.lane.b32.xlu1 %v709_v57, %s2534_s23 }
 0x28a   :  { %v697_v58 = vpop.permute.xlu1 %696  ;;  %v2938_v59 = vpop.permute.xlu0 %654 }
 0x28b   :  { %v700_v60 = vsel %vm128_vm1, %v695_v50, %v697_v58 }
 0x28c   :  { %750 = vrot.lane.b32.xlu0 %v700_v60, %s2534_s23 }
 0x28e   :  { %v688_v61 = vpop.permute.xlu1 %687  ;;  %v2942_v62 = vpop.permute.xlu0 %643 }
 0x28f   :  { %v691_v63 = vsel %vm116_vm2, %v686_v53, %v688_v61  ;;  %v646_v6 = vsel %vm140_vm0, %v642_v38, %v2942_v62  ;;  %v3041_v61 = vld [vmem:[%s3350_s2 + $0x8] sm:$0xff] }
 0x290   :  { %744 = vrot.lane.b32.xlu1 %v691_v63, %s2534_s23  ;;  %833 = vmatprep.subr.mxu1 %v646_v6 }
 0x291   :  { %834 = vmatpush1.msra.mxu1 %v645_v7 }
 0x292   :  { %v702_v8 = vpop.permute.xlu1 %701  ;;  %v2949_v9 = vpop.permute.xlu0 %632 }
 0x293   :  { %v2953_v10 = vsel %vm140_vm0, %v702_v8, %v2918_v48  ;;  %v2957_v2 = vsel %vm140_vm0, %v2942_v62, %v702_v8  ;;  %v635_v11 = vsel %vm128_vm1, %v631_v39, %v2949_v9 }
 0x294   :  { %754 = vrot.lane.b32.xlu0 %v2953_v10, %s2534_s23  ;;  %752 = vrot.lane.b32.xlu1 %v2957_v2, %s2534_s23 }
 0x295   :  { %835 = vmatprep.subr.mxu1 %v635_v11 }
 0x296   :  { %836 = vmatpush1.msra.mxu1 %v634_v12  ;;  %v693_v13 = vpop.permute.xlu1 %692  ;;  %v2966_v1 = vpop.permute.xlu0 %621 }
 0x297   :  { %v699_v15 = vsel %vm128_vm1, %v693_v13, %v695_v50  ;;  %v698_v16 = vsel %vm128_vm1, %v2949_v9, %v693_v13  ;;  %v624_v17 = vsel %vm116_vm2, %v620_v41, %v2966_v1 }
 0x298   :  { %748 = vrot.lane.b32.xlu1 %v699_v15, %s2534_s23  ;;  %746 = vrot.lane.b32.xlu0 %v698_v16, %s2534_s23 }
 0x299   :  { %837 = vmatprep.subr.mxu1 %v624_v17 }
 0x29a   :  { %838 = vmatpush1.msra.mxu1 %v623_v18  ;;  %v684_v19 = vpop.permute.xlu1 %683  ;;  %v2976_v0 = vpop.permute.xlu0 %610 }
 0x29b   :  { %v690_v20 = vsel %vm116_vm2, %v684_v19, %v686_v53  ;;  %v689_v21 = vsel %vm116_vm2, %v2966_v1, %v684_v19  ;;  %v613_v22 = vsel %vm104_vm3, %v609_v44, %v2976_v0  ;;  %v39_v53 = vld [vmem:[%s3350_s2 + $0x20] sm:$0xff] }
 0x29c   :  { %742 = vrot.lane.b32.xlu0 %v690_v20, %s2534_s23  ;;  %740 = vrot.lane.b32.xlu1 %v689_v21, %s2534_s23 }
 0x29d   :  { %839 = vmatprep.subr.mxu1 %v613_v22 }
 0x29e   :  { %840 = vmatpush1.msra.mxu1 %v612_v23  ;;  %v677_v4 = vpop.permute.xlu1 %676  ;;  %v2989_v26 = vpop.permute.xlu0 %588 }
 0x29f   :  { %841 = vmatprep.subr.mxu1 %v602_v24  ;;  %v681_v28 = vsel %vm104_vm3, %v677_v4, %v679_v54  ;;  %v680_v29 = vsel %vm104_vm3, %v2976_v0, %v677_v4 }
 0x2a0   :  { %736 = vrot.lane.b32.xlu1 %v681_v28, %s2534_s23  ;;  %734 = vrot.lane.b32.xlu0 %v680_v29, %s2534_s23 }
 0x2a2   :  { %v665_v30 = vpop.permute.xlu1 %664  ;;  %v2996_v31 = vpop.permute.xlu0 %566 }
 0x2a3   :  { %v668_v5 = vsel %vm80_vm5, %v2989_v26, %v665_v30  ;;  %v669_v38 = vsel %vm80_vm5, %v665_v30, %v2931_v56 }
 0x2a6   :  { %v653_v32 = vpop.permute.xlu1 %652  ;;  %v671_v34 = vpop.permute.xlu0 %670 }
 0x2a7   :  { %v675_v35 = vsel %vm92_vm4, %v671_v34, %v2916_v43  ;;  %v674_v36 = vsel %vm92_vm4, %v2926_v51, %v671_v34  ;;  %v657_v43 = vsel %vm56_vm7, %v653_v32, %v2938_v59 }
 0x2a8   :  { %730 = vrot.lane.b32.xlu0 %v675_v35, %s2534_s23  ;;  %728 = vrot.lane.b32.xlu1 %v674_v36, %s2534_s23 }
 0x2aa   :  { %v587_v3 = vpop.permute.xlu1 %586  ;;  %v659_v37 = vpop.permute.xlu0 %658 }
 0x2ab   :  { %v663_v41 = vsel %vm68_vm6, %v659_v37, %v2922_v49  ;;  %v662_v42 = vsel %vm68_vm6, %v2928_v52, %v659_v37  ;;  %v591_v45 = vsel %vm80_vm5, %v587_v3, %v2989_v26 }
 0x2ac   :  { %722 = vrot.lane.b32.xlu0 %v668_v5, %s2534_s23  ;;  %724 = vrot.lane.b32.xlu1 %v669_v38, %s2534_s23 }
 0x2ae   :  { %v596_v39 = vpop.permute.xlu0 %595  ;;  %v576_v44 = vpop.permute.xlu1 %575 }
 0x2af   :  { %v601_v40 = vsel %vm92_vm4, %v596_v39, %v2914_v46  ;;  %v656_v46 = vsel %vm56_vm7, %v2996_v31, %v653_v32  ;;  %v580_v50 = vsel %vm68_vm6, %v576_v44, %v2928_v52 }
 0x2b0   :  { %718 = vrot.lane.b32.xlu0 %v663_v41, %s2534_s23  ;;  %716 = vrot.lane.b32.xlu1 %v662_v42, %s2534_s23 }
 0x2b1   :  { %842 = vmatpush1.msra.mxu1 %v601_v40 }
 0x2b2   :  { %843 = vmatprep.subr.mxu1 %v591_v45  ;;  %v585_v47 = vpop.permute.xlu0 %584  ;;  %v565_v54 = vpop.permute.xlu1 %564 }
 0x2b3   :  { %v590_v49 = vsel %vm80_vm5, %v585_v47, %v587_v3  ;;  %v569_v57 = vsel %vm56_vm7, %v565_v54, %v2996_v31 }
 0x2b4   :  { %710 = vrot.lane.b32.xlu0 %v656_v46, %s2534_s23  ;;  %712 = vrot.lane.b32.xlu1 %v657_v43, %s2534_s23 }
 0x2b5   :  { %844 = vmatpush1.msra.mxu1 %v590_v49 }
 0x2b6   :  { %845 = vmatprep.subr.mxu1 %v580_v50  ;;  %v574_v55 = vpop.permute.xlu0 %573 }
 0x2b7   :  { %v579_v56 = vsel %vm68_vm6, %v574_v55, %v576_v44 }
 0x2b8   :  { %714 = vrot.lane.b32.xlu0 %v2938_v59, %s2534_s23  ;;  %813 = vperm.xlu1 %2481, %v39_v53  }
 0x2b9   :  { %846 = vmatpush1.msra.mxu1 %v579_v56 }
 0x2ba   :  { %847 = vmatprep.subr.mxu1 %v569_v57  ;;  %v563_v58 = vpop.permute.xlu0 %562 }
 0x2bb   :  { %v568_v60 = vsel %vm56_vm7, %v563_v58, %v565_v54 }
 0x2bc   :  { %848 = vmatpush1.msra.mxu1 %v568_v60 }
 0x2bd   :  { %849 = vmatprep.subr.mxu1 %v2843_v27 }
 0x2be   :  { %850 = vmatpush1.msra.mxu1 %v2841_v25 }
 0x2bf   :  { %2408 = vmatmul.mubr.msk.f32.vlgmr.msra.gmra.mxu1 %vm336_vm8, %v3041_v61  ;;  %2431 = vmatprep.subr.mxu1 %v2543_v14 }
 0x2c0   :  { %2449 = vmatprep.mubr.msk.f32.mxu1 %vm2545_vm10, %v2543_v14 }
 0x2e9   :  { %v733_v59 = vpop.permute.xlu1 %732 }
 0x2ed   :  { %v3050_v6 = vpop.permute.xlu1 %720 }
 0x2f5   :  { %v739_v63 = vpop.permute.xlu0 %738 }
 0x2f9   :  { %v727_v7 = vpop.permute.xlu0 %726 }
 0x2fa   :  { %v757_v8 = vpop.permute.xlu1 %756 }
 0x2fb   :  { %2432 = vmatpush3.msra.mxu1 %v757_v8 }
 0x2fc   :  { %2433 = vmatprep.subr.mxu1 %v2543_v14 }
 0x2fe   :  { %v751_v27 = vpop.permute.xlu0 %750 }
 0x2ff   :  { %2434 = vmatpush3.msra.mxu1 %v751_v27 }
 0x300   :  { %2435 = vmatprep.subr.mxu1 %v2543_v14 }
 0x302   :  { %v745_v25 = vpop.permute.xlu1 %744 }
 0x303   :  { %2436 = vmatpush3.msra.mxu1 %v745_v25 }
 0x304   :  { %2437 = vmatprep.subr.mxu1 %v2543_v14 }
 0x305   :  { %2438 = vmatpush3.msra.mxu1 %v739_v63 }
 0x306   :  { %v753_v11 = vpop.permute.xlu1 %752  ;;  %2439 = vmatprep.subr.mxu1 %v2543_v14  ;;  %v755_v12 = vpop.permute.xlu0 %754 }
 0x307   :  { %v772_v13 = vsel %vm140_vm0, %v753_v11, %v755_v12  ;;  %2440 = vmatpush3.msra.mxu1 %v733_v59  ;;  %v773_v15 = vsel %vm140_vm0, %v755_v12, %v757_v8 }
 0x308   :  { %904 = vmatprep.subr.mxu0 %v773_v15  ;;  %2441 = vmatprep.subr.mxu1 %v2543_v14  ;;  %v810_v16 = vsel %vm801_vm11, %v2942_v62, %v772_v13 }
 0x309   :  { %905 = vmatpush1.msra.mxu0 %v810_v16  ;;  %2442 = vmatpush3.msra.mxu1 %v727_v7 }
 0x30a   :  { %v749_v17 = vpop.permute.xlu1 %748  ;;  %2443 = vmatprep.subr.mxu1 %v2543_v14  ;;  %v747_v18 = vpop.permute.xlu0 %746 }
 0x30b   :  { %v770_v19 = vsel %vm140_vm0, %v747_v18, %v749_v17  ;;  %2444 = vmatpush3.msra.mxu1 %v3050_v6  ;;  %v771_v20 = vsel %vm140_vm0, %v749_v17, %v751_v27 }
 0x30c   :  { %906 = vmatprep.subr.mxu0 %v771_v20  ;;  %v809_v21 = vsel %vm801_vm11, %v2949_v9, %v770_v19  ;;  %2445 = vmatprep.subr.mxu1 %v2543_v14 }
 0x30d   :  { %907 = vmatpush1.msra.mxu0 %v809_v21 }
 0x30e   :  { %v741_v62 = vpop.permute.xlu1 %740  ;;  %v743_v22 = vpop.permute.xlu0 %742 }
 0x30f   :  { %v768_v23 = vsel %vm140_vm0, %v741_v62, %v743_v22  ;;  %v769_v4 = vsel %vm140_vm0, %v743_v22, %v745_v25 }
 0x310   :  { %908 = vmatprep.subr.mxu0 %v769_v4  ;;  %v808_v24 = vsel %vm801_vm11, %v2966_v1, %v768_v23 }
 0x311   :  { %909 = vmatpush1.msra.mxu0 %v808_v24 }
 0x312   :  { %v737_v28 = vpop.permute.xlu1 %736  ;;  %v735_v29 = vpop.permute.xlu0 %734 }
 0x313   :  { %v766_v30 = vsel %vm140_vm0, %v735_v29, %v737_v28  ;;  %v767_v9 = vsel %vm140_vm0, %v737_v28, %v739_v63 }
 0x314   :  { %910 = vmatprep.subr.mxu0 %v767_v9  ;;  %v807_v32 = vsel %vm801_vm11, %v2976_v0, %v766_v30 }
 0x315   :  { %911 = vmatpush1.msra.mxu0 %v807_v32 }
 0x31a   :  { %v729_v34 = vpop.permute.xlu1 %728  ;;  %v731_v35 = vpop.permute.xlu0 %730 }
 0x31b   :  { %v764_v36 = vsel %vm140_vm0, %v729_v34, %v731_v35  ;;  %v765_v3 = vsel %vm140_vm0, %v731_v35, %v733_v59 }
 0x31c   :  { %912 = vmatprep.subr.mxu0 %v765_v3  ;;  %v806_v1 = vsel %vm801_vm11, %v2926_v51, %v764_v36 }
 0x31d   :  { %913 = vmatpush1.msra.mxu0 %v806_v1 }
 0x31e   :  { %v725_v37 = vpop.permute.xlu1 %724  ;;  %v723_v5 = vpop.permute.xlu0 %722 }
 0x31f   :  { %v762_v38 = vsel %vm140_vm0, %v723_v5, %v725_v37  ;;  %v763_v39 = vsel %vm140_vm0, %v725_v37, %v727_v7 }
 0x320   :  { %914 = vmatprep.subr.mxu0 %v763_v39  ;;  %v805_v0 = vsel %vm801_vm11, %v2989_v26, %v762_v38 }
 0x321   :  { %915 = vmatpush1.msra.mxu0 %v805_v0 }
 0x322   :  { %v717_v40 = vpop.permute.xlu1 %716  ;;  %v719_v41 = vpop.permute.xlu0 %718 }
 0x323   :  { %v760_v42 = vsel %vm140_vm0, %v717_v40, %v719_v41  ;;  %v761_v44 = vsel %vm140_vm0, %v719_v41, %v3050_v6 }
 0x324   :  { %916 = vmatprep.subr.mxu0 %v761_v44  ;;  %v804_v51 = vsel %vm801_vm11, %v2928_v52, %v760_v42  ;;  %v802_v52 = vsel %vm801_vm11, %v2867_v33, %v2957_v2 }
 0x325   :  { %917 = vmatpush1.msra.mxu0 %v804_v51 }
 0x326   :  { %v713_v45 = vpop.permute.xlu1 %712  ;;  %v711_v47 = vpop.permute.xlu0 %710 }
 0x327   :  { %v758_v46 = vsel %vm140_vm0, %v711_v47, %v713_v45 }
 0x328   :  { %v803_v49 = vsel %vm801_vm11, %v2996_v31, %v758_v46 }
 0x32a   :  { %v715_v43 = vpop.permute.xlu0 %714 }
 0x32b   :  { %2446 = vmatpush3.msra.mxu1 %v715_v43  ;;  %v759_v26 = vsel %vm140_vm0, %v713_v45, %v715_v43 }
 0x32c   :  { %918 = vmatprep.subr.mxu0 %v759_v26  ;;  %2447 = vmatprep.subr.mxu1 %v2543_v14 }
 0x32d   :  { %919 = vmatpush1.msra.mxu0 %v803_v49  ;;  %2448 = vmatpush3.msra.mxu1 %v2918_v48 }
 0x32e   :  { %920 = vmatprep.subr.mxu0 %v2953_v10  ;;  %2450 = vmatmul.mubr.msk.f32.vlgmr.msra.gmra.mxu1 %vm336_vm8, %v3041_v61 }
 0x32f   :  { %921 = vmatpush1.msra.mxu0 %v802_v52  ;;  %1394 = vmatprep.mubr.f32.mxu1 %v2543_v14 }
 0x330   :  { %2409 = vmatmul.mubr.msk.f32.vlgmr.msra.gmra.mxu0 %vm336_vm8, %v3041_v61 }
 0x331   :  { %1323 = vmatprep.mubr.f32.mxu0 %v2543_v14 }
 0x333   :  { %v814_v31 = vpop.permute.xlu1 %813 }
 0x37f   :  { %v885_v50 = vpop.f32.mrf.mxu1 }
 0x380   :  { %v886_v48 = vadd.f32 %v885_v50, %v814_v31 }
 0x381   :  { %v887_v10 = vpop.f32.mrf.mxu1 }
 0x382   :  { %v3105_v53 = vmax.f32 %v886_v48, 0.0  ;;  %v888_v33 = vadd.f32 %v887_v10, %v814_v31 }
 0x384   :  { %1099 = vrot.lane.b32.xlu0 %v3105_v53, %s2535_s25  ;;  %1109 = vrot.lane.b32.xlu1 %v3105_v53, %s2534_s23  ;;  %v3115_v2 = vmax.f32 %v888_v33, 0.0 }
 0x388   :  { %1079 = vrot.lane.b32.xlu0 %v3105_v53, %s2537_s27  ;;  %1089 = vrot.lane.b32.xlu1 %v3105_v53, %s2536_s26 }
 0x38c   :  { %1111 = vrot.lane.b32.xlu0 %v3115_v2, %s2534_s23  ;;  %1101 = vrot.lane.b32.xlu1 %v3115_v2, %s2535_s25 }
 0x390   :  { %1091 = vrot.lane.b32.xlu0 %v3115_v2, %s2536_s26  ;;  %1081 = vrot.lane.b32.xlu1 %v3115_v2, %s2537_s27 }
 0x3ee   :  { %v1027_v54 = vpop.f32.mrf.mxu1 }
 0x3ef   :  { %v1028_v55 = vadd.f32 %v1027_v54, %v814_v31 }
 0x3f0   :  { %v2451_v56 = vpop.f32.mrf.mxu1  ;;  %v956_v58 = vpop.f32.mrf.mxu0 }
 0x3f1   :  { %v1035_v57 = vmax.f32 %v1028_v55, 0.0  ;;  %v957_v60 = vadd.f32 %v956_v58, %v814_v31 }
 0x3f2   :  { %v958_v59 = vpop.f32.mrf.mxu0 }
 0x3f3   :  { %1159 = vrot.lane.b32.xlu0 %v1035_v57, %s2535_s25  ;;  %1165 = vrot.lane.b32.xlu1 %v1035_v57, %s2534_s23  ;;  %v1033_v61 = vmax.f32 %v957_v60, 0.0  ;;  %v959_v63 = vadd.f32 %v958_v59, %v814_v31 }
 0x3f5   :  { %v1034_v6 = vmax.f32 %v959_v63, 0.0 }
 0x3f6   :  { %v1110_v7 = vpop.permute.xlu1 %1109  ;;  %v1100_v8 = vpop.permute.xlu0 %1099 }
 0x3f7   :  { %1147 = vrot.lane.b32.xlu0 %v1035_v57, %s2537_s27  ;;  %1153 = vrot.lane.b32.xlu1 %v1035_v57, %s2536_s26 }
 0x3fa   :  { %v1090_v27 = vpop.permute.xlu1 %1089  ;;  %v1080_v25 = vpop.permute.xlu0 %1079 }
 0x3fb   :  { %1135 = vrot.lane.b32.xlu0 %v1035_v57, %s2539_s29  ;;  %1141 = vrot.lane.b32.xlu1 %v1035_v57, %s2538_s28 }
 0x3fe   :  { %v1102_v11 = vpop.permute.xlu1 %1101  ;;  %v1112_v12 = vpop.permute.xlu0 %1111 }
 0x3ff   :  { %1123 = vrot.lane.b32.xlu0 %v1035_v57, %s2541_s4  ;;  %1129 = vrot.lane.b32.xlu1 %v1035_v57, %s2540_s30  ;;  %v1115_v28 = vsel %vm140_vm0, %v1110_v7, %v1112_v12  ;;  %v1105_v30 = vsel %vm128_vm1, %v1100_v8, %v1102_v11 }
 0x402   :  { %v1082_v13 = vpop.permute.xlu1 %1081  ;;  %v1092_v15 = vpop.permute.xlu0 %1091 }
 0x403   :  { %1103 = vrot.lane.b32.xlu1 %v1033_v61, %s2535_s25  ;;  %1113 = vrot.lane.b32.xlu0 %v1033_v61, %s2534_s23  ;;  %v1095_v35 = vsel %vm116_vm2, %v1090_v27, %v1092_v15  ;;  %v1085_v3 = vsel %vm104_vm3, %v1080_v25, %v1082_v13 }
 0x407   :  { %1083 = vrot.lane.b32.xlu1 %v1033_v61, %s2537_s27  ;;  %1093 = vrot.lane.b32.xlu0 %v1033_v61, %s2536_s26 }
 0x40b   :  { %1063 = vrot.lane.b32.xlu1 %v1033_v61, %s2539_s29  ;;  %1073 = vrot.lane.b32.xlu0 %v1033_v61, %s2538_s28 }
 0x40f   :  { %1043 = vrot.lane.b32.xlu1 %v1033_v61, %s2541_s4  ;;  %1053 = vrot.lane.b32.xlu0 %v1033_v61, %s2540_s30 }
 0x413   :  { %1157 = vrot.lane.b32.xlu1 %v1034_v6, %s2535_s25  ;;  %1163 = vrot.lane.b32.xlu0 %v1034_v6, %s2534_s23 }
 0x417   :  { %1145 = vrot.lane.b32.xlu1 %v1034_v6, %s2537_s27  ;;  %1151 = vrot.lane.b32.xlu0 %v1034_v6, %s2536_s26 }
 0x41b   :  { %1133 = vrot.lane.b32.xlu1 %v1034_v6, %s2539_s29  ;;  %1139 = vrot.lane.b32.xlu0 %v1034_v6, %s2538_s28 }
 0x41f   :  { %1069 = vrot.lane.b32.xlu1 %v3105_v53, %s2538_s28  ;;  %1127 = vrot.lane.b32.xlu0 %v1034_v6, %s2540_s30 }
 0x423   :  { %1121 = vrot.lane.b32.xlu1 %v1034_v6, %s2541_s4  ;;  %1071 = vrot.lane.b32.xlu0 %v3115_v2, %s2538_s28 }
 0x427   :  { %1061 = vrot.lane.b32.xlu1 %v3115_v2, %s2539_s29  ;;  %1059 = vrot.lane.b32.xlu0 %v3105_v53, %s2539_s29 }
 0x42b   :  { %1049 = vrot.lane.b32.xlu1 %v3105_v53, %s2540_s30  ;;  %1051 = vrot.lane.b32.xlu0 %v3115_v2, %s2540_s30 }
 0x42f   :  { %1041 = vrot.lane.b32.xlu1 %v3115_v2, %s2541_s4 }
 0x465   :  { %v1166_v16 = vpop.permute.xlu1 %1165  ;;  %v1160_v17 = vpop.permute.xlu0 %1159 }
 0x466   :  { %1215 = vrot.lane.b32.xlu0 %v1166_v16, %s2534_s23  ;;  %1209 = vrot.lane.b32.xlu1 %v1160_v17, %s2534_s23 }
 0x469   :  { %v1154_v18 = vpop.permute.xlu1 %1153  ;;  %v1148_v19 = vpop.permute.xlu0 %1147 }
 0x46a   :  { %1203 = vrot.lane.b32.xlu0 %v1154_v18, %s2534_s23  ;;  %1197 = vrot.lane.b32.xlu1 %v1148_v19, %s2534_s23 }
 0x46d   :  { %v1142_v20 = vpop.permute.xlu1 %1141  ;;  %v3167_v21 = vpop.permute.xlu0 %1135 }
 0x46e   :  { %1191 = vrot.lane.b32.xlu0 %v1142_v20, %s2534_s23  ;;  %1185 = vrot.lane.b32.xlu1 %v3167_v21, %s2534_s23 }
 0x471   :  { %v3172_v62 = vpop.permute.xlu1 %1129  ;;  %v3174_v22 = vpop.permute.xlu0 %1123 }
 0x472   :  { %1179 = vrot.lane.b32.xlu0 %v3172_v62, %s2534_s23  ;;  %1173 = vrot.lane.b32.xlu1 %v3174_v22, %s2534_s23 }
 0x475   :  { %v1104_v23 = vpop.permute.xlu1 %1103  ;;  %v1114_v4 = vpop.permute.xlu0 %1113 }
 0x476   :  { %v1116_v24 = vsel %vm140_vm0, %v1112_v12, %v1114_v4  ;;  %v1106_v29 = vsel %vm128_vm1, %v1102_v11, %v1104_v23 }
 0x477   :  { %1273 = vmatprep.subr.mxu0 %v1116_v24 }
 0x478   :  { %1274 = vmatpush1.msra.mxu0 %v1115_v28 }
 0x479   :  { %v1084_v9 = vpop.permute.xlu1 %1083  ;;  %1275 = vmatprep.subr.mxu0 %v1106_v29  ;;  %v1094_v32 = vpop.permute.xlu0 %1093 }
 0x47a   :  { %1276 = vmatpush1.msra.mxu0 %v1105_v30  ;;  %v1096_v34 = vsel %vm116_vm2, %v1092_v15, %v1094_v32  ;;  %v1086_v36 = vsel %vm104_vm3, %v1082_v13, %v1084_v9 }
 0x47b   :  { %1277 = vmatprep.subr.mxu0 %v1096_v34 }
 0x47c   :  { %1278 = vmatpush1.msra.mxu0 %v1095_v35 }
 0x47d   :  { %v1064_v1 = vpop.permute.xlu1 %1063  ;;  %1279 = vmatprep.subr.mxu0 %v1086_v36  ;;  %v1074_v37 = vpop.permute.xlu0 %1073 }
 0x47e   :  { %1280 = vmatpush1.msra.mxu0 %v1085_v3 }
 0x481   :  { %v1044_v5 = vpop.permute.xlu1 %1043  ;;  %v1054_v38 = vpop.permute.xlu0 %1053 }
 0x485   :  { %v1158_v39 = vpop.permute.xlu1 %1157  ;;  %v1164_v0 = vpop.permute.xlu0 %1163 }
 0x486   :  { %v3189_v40 = vsel %vm140_vm0, %v1114_v4, %v1164_v0  ;;  %v3192_v41 = vsel %vm140_vm0, %v1164_v0, %v1166_v16  ;;  %v1161_v51 = vsel %vm128_vm1, %v1104_v23, %v1158_v39  ;;  %v1162_v45 = vsel %vm128_vm1, %v1158_v39, %v1160_v17  ;;  %v40_v17 = vld [vmem:[%s3350_s2 + $0x28] sm:$0xff] }
 0x487   :  { %1213 = vrot.lane.b32.xlu1 %v3192_v41, %s2534_s23  ;;  %1211 = vrot.lane.b32.xlu0 %v3189_v40, %s2534_s23 }
 0x489   :  { %v1146_v42 = vpop.permute.xlu1 %1145  ;;  %v1152_v44 = vpop.permute.xlu0 %1151 }
 0x48a   :  { %v1155_v43 = vsel %vm116_vm2, %v1094_v32, %v1152_v44  ;;  %v1156_v26 = vsel %vm116_vm2, %v1152_v44, %v1154_v18  ;;  %v1149_v31 = vsel %vm104_vm3, %v1084_v9, %v1146_v42  ;;  %v1150_v50 = vsel %vm104_vm3, %v1146_v42, %v1148_v19 }
 0x48b   :  { %1205 = vrot.lane.b32.xlu1 %v1161_v51, %s2534_s23  ;;  %1207 = vrot.lane.b32.xlu0 %v1162_v45, %s2534_s23 }
 0x48d   :  { %v1134_v47 = vpop.permute.xlu1 %1133  ;;  %v1140_v46 = vpop.permute.xlu0 %1139 }
 0x48e   :  { %v1143_v33 = vsel %vm92_vm4, %v1074_v37, %v1140_v46  ;;  %v1144_v54 = vsel %vm92_vm4, %v1140_v46, %v1142_v20  ;;  %v1137_v60 = vsel %vm80_vm5, %v1064_v1, %v1134_v47  ;;  %v1138_v61 = vsel %vm80_vm5, %v1134_v47, %v3167_v21 }
 0x48f   :  { %1201 = vrot.lane.b32.xlu1 %v1156_v26, %s2534_s23  ;;  %1199 = vrot.lane.b32.xlu0 %v1155_v43, %s2534_s23 }
 0x491   :  { %v1070_v49 = vpop.permute.xlu1 %1069  ;;  %v1128_v52 = vpop.permute.xlu0 %1127 }
 0x492   :  { %v1131_v8 = vsel %vm68_vm6, %v1054_v38, %v1128_v52  ;;  %v1132_v27 = vsel %vm68_vm6, %v1128_v52, %v3172_v62 }
 0x493   :  { %1193 = vrot.lane.b32.xlu1 %v1149_v31, %s2534_s23  ;;  %1195 = vrot.lane.b32.xlu0 %v1150_v50, %s2534_s23 }
 0x495   :  { %v1122_v48 = vpop.permute.xlu1 %1121  ;;  %v1072_v10 = vpop.permute.xlu0 %1071 }
 0x496   :  { %v1075_v55 = vsel %vm92_vm4, %v1070_v49, %v1072_v10  ;;  %v1076_v56 = vsel %vm92_vm4, %v1072_v10, %v1074_v37  ;;  %v1125_v13 = vsel %vm56_vm7, %v1044_v5, %v1122_v48  ;;  %v1126_v15 = vsel %vm56_vm7, %v1122_v48, %v3174_v22 }
 0x497   :  { %1189 = vrot.lane.b32.xlu1 %v1144_v54, %s2534_s23  ;;  %1187 = vrot.lane.b32.xlu0 %v1143_v33, %s2534_s23 }
 0x498   :  { %1281 = vmatprep.subr.mxu0 %v1076_v56 }
 0x499   :  { %1282 = vmatpush1.msra.mxu0 %v1075_v55  ;;  %v1062_v57 = vpop.permute.xlu1 %1061  ;;  %v1060_v58 = vpop.permute.xlu0 %1059  ;;  %v37_v55 = vld [vmem:[%s3350_s2 + $0x10] sm:$0xff] }
 0x49a   :  { %v1065_v59 = vsel %vm80_vm5, %v1060_v58, %v1062_v57  ;;  %v1066_v63 = vsel %vm80_vm5, %v1062_v57, %v1064_v1  ;;  %v1642_v58 = vld [vmem:[#allocation3 + $0x188] sm:$0xff]  ;;  %vm2314_vm5 = vcmask 261120  }
 0x49b   :  { %1181 = vrot.lane.b32.xlu1 %v1137_v60, %s2534_s23  ;;  %1183 = vrot.lane.b32.xlu0 %v1138_v61, %s2534_s23  ;;  %v1641_v60 = vld [vmem:[#allocation3 + $0x180] sm:$0xff]  ;;  %v1643_v61 = vld [vmem:[#allocation3 + $0x190] sm:$0xff] }
 0x49c   :  { %1283 = vmatprep.subr.mxu0 %v1066_v63  ;;  %v1628_v63 = vld [vmem:[#allocation3 + $0x118] sm:$0xff] }
 0x49d   :  { %1284 = vmatpush1.msra.mxu0 %v1065_v59  ;;  %v1050_v6 = vpop.permute.xlu1 %1049  ;;  %v1052_v7 = vpop.permute.xlu0 %1051  ;;  %v1626_v59 = vld [vmem:[#allocation3 + $0x108] sm:$0xff] }
 0x49e   :  { %v1055_v25 = vsel %vm68_vm6, %v1050_v6, %v1052_v7  ;;  %v1056_v11 = vsel %vm68_vm6, %v1052_v7, %v1054_v38  ;;  %v1627_v6 = vld [vmem:[#allocation3 + $0x110] sm:$0xff]  ;;  %v1610_v7 = vld [vmem:[#allocation3 + $0x88] sm:$0xff]  ;;  %vm2388_vm6 = vcmask 123904  }
 0x49f   :  { %1177 = vrot.lane.b32.xlu1 %v1132_v27, %s2534_s23  ;;  %1175 = vrot.lane.b32.xlu0 %v1131_v8, %s2534_s23  ;;  %v1594_v8 = vld [vmem:[#allocation3 + $0x8] sm:$0xff]  ;;  %v1611_v27 = vld [vmem:[#allocation3 + $0x90] sm:$0xff] }
 0x4a0   :  { %1285 = vmatprep.subr.mxu0 %v1056_v11  ;;  %v1593_v11 = vld [vmem:[#allocation3] sm:$0xff] }
 0x4a1   :  { %1286 = vmatpush1.msra.mxu0 %v1055_v25  ;;  %v3230_v12 = vpop.permute.xlu1 %1041  ;;  %v1596_v25 = vld [vmem:[#allocation3 + $0x18] sm:$0xff] }
 0x4a2   :  { %v1046_v16 = vsel %vm56_vm7, %v3230_v12, %v1044_v5 }
 0x4a3   :  { %1169 = vrot.lane.b32.xlu1 %v1125_v13, %s2534_s23  ;;  %1171 = vrot.lane.b32.xlu0 %v1126_v15, %s2534_s23  ;;  %v1646_v13 = vld [vmem:[#allocation3 + $0x1a8] sm:$0xff]  ;;  %v1648_v15 = vld [vmem:[#allocation3 + $0x1b8] sm:$0xff] }
 0x4a4   :  { %1287 = vmatprep.subr.mxu0 %v1046_v16  ;;  %v1405_v16 = vlaneseq }
 0x4a6   :  { %vm3274_vm4 = vcmp.lt.s32.totalorder %v1405_v16, 256 }
 0x4a7   :  { %1039 = vrot.lane.b32.xlu0 %v3105_v53, %s2541_s4 }
 0x4ab   :  { %1253 = vperm.xlu0 %2482, %v40_v17   ;;  %v1406_v17 = vand.u32 127, %v1405_v16 }
 0x4d8   :  { %v1210_v18 = vpop.permute.xlu1 %1209  ;;  %v1216_v19 = vpop.permute.xlu0 %1215 }
 0x4dc   :  { %v1198_v20 = vpop.permute.xlu1 %1197  ;;  %v1204_v21 = vpop.permute.xlu0 %1203 }
 0x4e0   :  { %v1186_v62 = vpop.permute.xlu1 %1185  ;;  %v1192_v22 = vpop.permute.xlu0 %1191 }
 0x4e4   :  { %v1174_v23 = vpop.permute.xlu1 %1173  ;;  %v1180_v4 = vpop.permute.xlu0 %1179 }
 0x4f9   :  { %v1214_v24 = vpop.permute.xlu1 %1213  ;;  %v1212_v28 = vpop.permute.xlu0 %1211 }
 0x4fa   :  { %v1231_v29 = vsel %vm140_vm0, %v1212_v28, %v1214_v24  ;;  %v1232_v30 = vsel %vm140_vm0, %v1214_v24, %v1216_v19  ;;  %v1408_v19 = vadd.s32 256, %v1406_v17  ;;  %v2546_v24 = vmov 1966171168  }
 0x4fb   :  { %1344 = vmatprep.subr.mxu1 %v1232_v30  ;;  %v1438_v28 = vunpack.c.l.s4 %v2546_v24  ;;  %v1410_v30 = vand.u32 255, %v1406_v17 }
 0x4fc   :  { %1345 = vmatpush1.msra.mxu1 %v1231_v29 }
 0x4fd   :  { %v1206_v9 = vpop.permute.xlu1 %1205  ;;  %v1208_v32 = vpop.permute.xlu0 %1207 }
 0x4fe   :  { %v1229_v34 = vsel %vm140_vm0, %v1206_v9, %v1208_v32  ;;  %v1230_v35 = vsel %vm140_vm0, %v1208_v32, %v1210_v18  ;;  %v1409_v18 = vadd.s32 384, %v1406_v17 }
 0x4ff   :  { %1346 = vmatprep.subr.mxu1 %v1230_v35 }
 0x500   :  { %1347 = vmatpush1.msra.mxu1 %v1229_v34 }
 0x501   :  { %v1202_v36 = vpop.permute.xlu1 %1201  ;;  %v1200_v3 = vpop.permute.xlu0 %1199 }
 0x502   :  { %v1227_v1 = vsel %vm140_vm0, %v1200_v3, %v1202_v36  ;;  %v1228_v37 = vsel %vm140_vm0, %v1202_v36, %v1204_v21  ;;  %v1413_v21 = vand.u32 255, %v1409_v18  ;;  %v1439_v36 = vunpack.c.0.s8 %v1438_v28 }
 0x503   :  { %1348 = vmatprep.subr.mxu1 %v1228_v37  ;;  %v3271_v3 = vshrl.u32 %v1405_v16, 7 }
 0x504   :  { %1349 = vmatpush1.msra.mxu1 %v1227_v1  ;;  %vm1425_vm13 = vcmp.lt.s32.totalorder %v1413_v21, 160 }
 0x505   :  { %v1194_v5 = vpop.permute.xlu1 %1193  ;;  %v1196_v38 = vpop.permute.xlu0 %1195 }
 0x506   :  { %v1225_v39 = vsel %vm140_vm0, %v1194_v5, %v1196_v38  ;;  %v1226_v0 = vsel %vm140_vm0, %v1196_v38, %v1198_v20  ;;  %v1407_v20 = vadd.s32 128, %v1406_v17  ;;  %v1414_v38 = vand.u32 15, %v1410_v30  ;;  %v1645_v30 = vld [vmem:[#allocation3 + $0x1a0] sm:$0xff] }
 0x507   :  { %1350 = vmatprep.subr.mxu1 %v1226_v0 }
 0x508   :  { %1351 = vmatpush1.msra.mxu1 %v1225_v39  ;;  %vm1418_vm2 = vcmp.lt.s32.totalorder %v1414_v38, 10  ;;  %v1631_v38 = vld [vmem:[#allocation3 + $0x130] sm:$0xff] }
 0x509   :  { %v1190_v42 = vpop.permute.xlu1 %1189  ;;  %v1188_v44 = vpop.permute.xlu0 %1187 }
 0x50a   :  { %v1223_v51 = vsel %vm140_vm0, %v1188_v44, %v1190_v42  ;;  %v1224_v45 = vsel %vm140_vm0, %v1190_v42, %v1192_v22  ;;  %v1411_v22 = vand.u32 255, %v1407_v20 }
 0x50b   :  { %1352 = vmatprep.subr.mxu1 %v1224_v45 }
 0x50c   :  { %1353 = vmatpush1.msra.mxu1 %v1223_v51  ;;  %v1415_v32 = vand.u32 15, %v1411_v22  ;;  %vm1423_vm1 = vcmp.lt.s32.totalorder %v1411_v22, 160  ;;  %v1442_v51 = vsub.s32 %v1439_v36, %v3271_v3  ;;  %v1630_v36 = vld [vmem:[#allocation3 + $0x128] sm:$0xff] }
 0x50d   :  { %v1182_v47 = vpop.permute.xlu1 %1181  ;;  %v1184_v46 = vpop.permute.xlu0 %1183 }
 0x50e   :  { %v1221_v43 = vsel %vm140_vm0, %v1182_v47, %v1184_v46  ;;  %v1222_v26 = vsel %vm140_vm0, %v1184_v46, %v1186_v62  ;;  %v1412_v62 = vand.u32 255, %v1408_v19 }
 0x50f   :  { %1354 = vmatprep.subr.mxu1 %v1222_v26 }
 0x510   :  { %1355 = vmatpush1.msra.mxu1 %v1221_v43 }
 0x511   :  { %v1178_v49 = vpop.permute.xlu1 %1177  ;;  %v1176_v52 = vpop.permute.xlu0 %1175 }
 0x512   :  { %v1219_v31 = vsel %vm140_vm0, %v1176_v52, %v1178_v49  ;;  %v1220_v50 = vsel %vm140_vm0, %v1178_v49, %v1180_v4  ;;  %v1416_v4 = vand.u32 15, %v1412_v62 }
 0x513   :  { %1356 = vmatprep.subr.mxu1 %v1220_v50 }
 0x514   :  { %1357 = vmatpush1.msra.mxu1 %v1219_v31  ;;  %vm1420_vm14 = vcmp.lt.s32.totalorder %v1416_v4, 10 }
 0x515   :  { %v1170_v48 = vpop.permute.xlu1 %1169  ;;  %v1172_v10 = vpop.permute.xlu0 %1171 }
 0x516   :  { %v1217_v33 = vsel %vm140_vm0, %v1170_v48, %v1172_v10  ;;  %v1218_v54 = vsel %vm140_vm0, %v1172_v10, %v1174_v23  ;;  %v1417_v23 = vand.u32 15, %v1413_v21  ;;  %vm1419_vm0 = vcmp.lt.s32.totalorder %v1415_v32, 10  ;;  %v1634_v10 = vld [vmem:[#allocation3 + $0x148] sm:$0xff] }
 0x517   :  { %1358 = vmatprep.subr.mxu1 %v1218_v54  ;;  %vm1427_vm3 = vmand %vm1419_vm0, %vm1423_vm1 }
 0x518   :  { %1359 = vmatpush1.msra.mxu1 %v1217_v33  ;;  %vm1421_vm12 = vcmp.lt.s32.totalorder %v1417_v23, 10 }
 0x519   :  { %1360 = vmatprep.subr.mxu1 %v3192_v41  ;;  %v1040_v56 = vpop.permute.xlu0 %1039  ;;  %v1644_v41 = vld [vmem:[#allocation3 + $0x198] sm:$0xff]  ;;  %vm1429_vm15 = vmand %vm1421_vm12, %vm1425_vm13 }
 0x51a   :  { %v1045_v57 = vsel %vm56_vm7, %v1040_v56, %v3230_v12  ;;  %1361 = vmatpush1.msra.mxu1 %v3189_v40  ;;  %v1625_v40 = vld [vmem:[#allocation3 + $0x100] sm:$0xff]  ;;  %v1595_v12 = vld [vmem:[#allocation3 + $0x10] sm:$0xff] }
 0x51b   :  { %1288 = vmatpush1.msra.mxu0 %v1045_v57  ;;  %2412 = vmatmul.mubr.msk.f32.vlgmr.msra.gmra.mxu1 %vm336_vm8, %v37_v55 }
 0x51c   :  { %1289 = vmatprep.subr.mxu0 %v3115_v2  ;;  %1843 = vmatprep.subr.mxu1 %v1644_v41  ;;  %v1612_v2 = vld [vmem:[#allocation3 + $0x98] sm:$0xff] }
 0x51d   :  { %1290 = vmatpush1.msra.mxu0 %v3105_v53  ;;  %1844 = vmatpush1.xpose.msra.mxu1 %v1643_v61  ;;  %v1609_v53 = vld [vmem:[#allocation3 + $0x80] sm:$0xff] }
 0x51e   :  { %2411 = vmatmul.mubr.msk.f32.vlgmr.msra.gmra.mxu0 %vm336_vm8, %v37_v55  ;;  %1773 = vmatprep.subr.mxu0 %v1642_v58 }
 0x51f   :  { %1774 = vmatpush1.xpose.msra.mxu0 %v1641_v60  ;;  %1845 = vmatprep.subr.mxu1 %v1628_v63  ;;  %v2547_v60 = vmov 1983009808  }
 0x520   :  { %1775 = vmatprep.subr.mxu0 %v1626_v59  ;;  %v1667_v41 = vunpack.c.l.s4 %v2547_v60  ;;  %v1620_v60 = vld [vmem:[#allocation3 + $0xd8] sm:$0xff] }
 0x521   :  { %1846 = vmatpush1.xpose.msra.mxu1 %v1627_v6 }
 0x522   :  { %1847 = vmatprep.subr.mxu1 %v1612_v2  ;;  %v1668_v17 = vunpack.c.0.s8 %v1667_v41  ;;  %v1617_v41 = vld [vmem:[#allocation3 + $0xc0] sm:$0xff] }
 0x523   :  { %1776 = vmatpush1.xpose.msra.mxu0 %v1625_v40 }
 0x524   :  { %1777 = vmatprep.subr.mxu0 %v1610_v7  ;;  %v3311_v20 = vsub.s32 %v1668_v17, %v3271_v3  ;;  %v1640_v17 = vld [vmem:[#allocation3 + $0x178] sm:$0xff] }
 0x525   :  { %1848 = vmatpush1.xpose.msra.mxu1 %v1611_v27 }
 0x526   :  { %1849 = vmatprep.subr.mxu1 %v1596_v25  ;;  %v1254_v29 = vpop.permute.xlu0 %1253 }
 0x527   :  { %1778 = vmatpush1.xpose.msra.mxu0 %v1609_v53 }
 0x528   :  { %1779 = vmatprep.subr.mxu0 %v1594_v8 }
 0x529   :  { %1850 = vmatpush1.xpose.msra.mxu1 %v1595_v12 }
 0x52a   :  { %1983 = vmatprep.subr.mxu1 %v1648_v15 }
 0x52b   :  { %1780 = vmatpush1.xpose.msra.mxu0 %v1593_v11 }
 0x52c   :  { %1913 = vmatprep.subr.mxu0 %v1646_v13 }
 0x5db   :  { %v1396_v9 = vpop.f32.mrf.mxu1 }
 0x5dc   :  { %v1397_v34 = vadd.f32 %v1396_v9, %v1254_v29 }
 0x5dd   :  { %v1398_v35 = vpop.f32.mrf.mxu1 }
 0x5de   :  { %v1325_v1 = vpop.f32.mrf.mxu0  ;;  %v1399_v37 = vadd.f32 %v1398_v35, %v1254_v29  ;;  %v1403_v5 = vmax.f32 %v1397_v34, 0.0  ;;  %v1647_v35 = vld [vmem:[#allocation3 + $0x1b0] sm:$0xff] }
 0x5df   :  { %v1326_v39 = vadd.f32 %v1325_v1, %v1254_v29  ;;  %v1632_v1 = vld [vmem:[#allocation3 + $0x138] sm:$0xff] }
 0x5e0   :  { %v1404_v0 = vmax.f32 %v1399_v37, 0.0  ;;  %v1432_v42 = vsel %vm1420_vm14, %v1403_v5, 0.0  ;;  %v1327_v44 = vpop.f32.mrf.mxu0  ;;  %v1629_v37 = vld [vmem:[#allocation3 + $0x120] sm:$0xff]  ;;  %v1614_v5 = vld [vmem:[#allocation3 + $0xa8] sm:$0xff] }
 0x5e1   :  { %v1401_v45 = vmax.f32 %v1326_v39, 0.0  ;;  %v1328_v47 = vadd.f32 %v1327_v44, %v1254_v29  ;;  %v1616_v39 = vld [vmem:[#allocation3 + $0xb8] sm:$0xff]  ;;  %v1598_v44 = vld [vmem:[#allocation3 + $0x28] sm:$0xff] }
 0x5e2   :  { %v1433_v46 = vsel %vm1429_vm15, %v1404_v0, 0.0  ;;  %v1613_v0 = vld [vmem:[#allocation3 + $0xa0] sm:$0xff] }
 0x5e3   :  { %v1515_v43 = vcombine.low %v1432_v42, %v1433_v46  ;;  %v1552_v26 = vcombine.high %v1432_v42, %v1433_v46  ;;  %v1402_v49 = vmax.f32 %v1328_v47, 0.0  ;;  %v1430_v50 = vsel %vm1418_vm2, %v1401_v45, 0.0  ;;  %v1600_v45 = vld [vmem:[#allocation3 + $0x38] sm:$0xff]  ;;  %v1597_v46 = vld [vmem:[#allocation3 + $0x20] sm:$0xff] }
 0x5e5   :  { %v1522_v52 = vrot.slane %v1515_v43, %v1442_v51  ;;  %v1559_v31 = vrot.slane %v1552_v26, %v1442_v51  ;;  %v1431_v48 = vsel %vm1427_vm3, %v1402_v49, 0.0  ;;  %v1650_v43 = vld [vmem:[#allocation3 + $0x1c8] sm:$0xff]  ;;  %v1599_v49 = vld [vmem:[#allocation3 + $0x30] sm:$0xff] }
 0x5e6   :  { %v1436_v33 = vcombine.low %v1430_v50, %v1431_v48  ;;  %v1476_v54 = vcombine.high %v1430_v50, %v1431_v48  ;;  %v1649_v50 = vld [vmem:[#allocation3 + $0x1c0] sm:$0xff] }
 0x5e7   :  { %v1529_v55 = vrot.slane %v1522_v52, %v1442_v51  ;;  %v1533_v56 = vcombine.high %v1522_v52, %v1522_v52  ;;  %v1566_v57 = vrot.slane %v1559_v31, %v1442_v51  ;;  %v1570_v58 = vcombine.high %v1559_v31, %v1559_v31  ;;  %v1652_v52 = vld [vmem:[#allocation3 + $0x1d8] sm:$0xff] }
 0x5e8   :  { %v1443_v61 = vrot.slane %v1436_v33, %v1442_v51  ;;  %v1483_v59 = vrot.slane %v1476_v54, %v1442_v51  ;;  %v1651_v33 = vld [vmem:[#allocation3 + $0x1d0] sm:$0xff] }
 0x5e9   :  { %1532 = vst.msk [vmem:[#allocation2 + $0x1] ss:$2 sm:$0x3] %vm3274_vm4, %v1529_v55  ;;  %v1540_v40 = vrot.slane %v1533_v56, %v1442_v51  ;;  %v1544_v63 = vcombine.high %v1529_v55, %v1529_v55  ;;  %1569 = vst.msk [vmem:[#allocation2 + $0x11] ss:$2 sm:$0x3] %vm3274_vm4, %v1566_v57  ;;  %v1577_v6 = vrot.slane %v1570_v58, %v1442_v51 }
 0x5ea   :  { %v1581_v7 = vcombine.high %v1566_v57, %v1566_v57  ;;  %v1450_v53 = vrot.slane %v1443_v61, %v1442_v51  ;;  %v1457_v2 = vcombine.high %v1443_v61, %v1443_v61  ;;  %v1490_v8 = vrot.slane %v1483_v59, %v1442_v51  ;;  %v1636_v55 = vld [vmem:[#allocation3 + $0x158] sm:$0xff]  ;;  %v1633_v56 = vld [vmem:[#allocation3 + $0x140] sm:$0xff]  ;;  %v1618_v57 = vld [vmem:[#allocation3 + $0xc8] sm:$0xff] }
 0x5eb   :  { %v1494_v27 = vcombine.high %v1483_v59, %v1483_v59  ;;  %1543 = vst.msk [vmem:[#allocation2 + $0x5] ss:$2 sm:$0x3] %vm3274_vm4, %v1540_v40  ;;  %1547 = vst.msk [vmem:[#allocation2 + $0x9] ss:$2 sm:$0x3] %vm3274_vm4, %v1544_v63  ;;  %v1548_v25 = vcombine.high %v1540_v40, %v1540_v40  ;;  %v1585_v11 = vcombine.high %v1577_v6, %v1577_v6 }
 0x5ec   :  { %1580 = vst.msk [vmem:[#allocation2 + $0x15] ss:$2 sm:$0x3] %vm3274_vm4, %v1577_v6  ;;  %1584 = vst.msk [vmem:[#allocation2 + $0x19] ss:$2 sm:$0x3] %vm3274_vm4, %v1581_v7  ;;  %v1464_v12 = vrot.slane %v1457_v2, %v1442_v51  ;;  %v1468_v13 = vcombine.high %v1450_v53, %v1450_v53  ;;  %v1505_v16 = vcombine.high %v1490_v8, %v1490_v8 }
 0x5ed   :  { %1456 = vst.msk [vmem:[#allocation2] ss:$2 sm:$0x3] %vm3274_vm4, %v1450_v53  ;;  %1493 = vst.msk [vmem:[#allocation2 + $0x10] ss:$2 sm:$0x3] %vm3274_vm4, %v1490_v8  ;;  %v1501_v15 = vrot.slane %v1494_v27, %v1442_v51 }
 0x5ee   :  { %1551 = vst.msk [vmem:[#allocation2 + $0xd] ss:$2 sm:$0x3] %vm3274_vm4, %v1548_v25  ;;  %1588 = vst.msk [vmem:[#allocation2 + $0x1d] ss:$2 sm:$0x3] %vm3274_vm4, %v1585_v11  ;;  %v1472_v18 = vcombine.high %v1464_v12, %v1464_v12 }
 0x5ef   :  { %1467 = vst.msk [vmem:[#allocation2 + $0x4] ss:$2 sm:$0x3] %vm3274_vm4, %v1464_v12  ;;  %1471 = vst.msk [vmem:[#allocation2 + $0x8] ss:$2 sm:$0x3] %vm3274_vm4, %v1468_v13  ;;  %v1509_v19 = vcombine.high %v1501_v15, %v1501_v15 }
 0x5f0   :  { %1504 = vst.msk [vmem:[#allocation2 + $0x14] ss:$2 sm:$0x3] %vm3274_vm4, %v1501_v15  ;;  %1508 = vst.msk [vmem:[#allocation2 + $0x18] ss:$2 sm:$0x3] %vm3274_vm4, %v1505_v16 }
 0x5f1   :  { %1475 = vst.msk [vmem:[#allocation2 + $0xc] ss:$2 sm:$0x3] %vm3274_vm4, %v1472_v18  ;;  %1512 = vst.msk [vmem:[#allocation2 + $0x1c] ss:$2 sm:$0x3] %vm3274_vm4, %v1509_v19 }
 0x5f2   :  { %v1615_v51 = vld [vmem:[#allocation3 + $0xb0] sm:$0xff]  ;;  %v1602_v59 = vld [vmem:[#allocation3 + $0x48] sm:$0xff]  ;;  %v1604_v63 = vld [vmem:[#allocation3 + $0x58] sm:$0xff] }
 0x5f3   :  { %v1635_v58 = vld [vmem:[#allocation3 + $0x150] sm:$0xff]  ;;  %v1601_v7 = vld [vmem:[#allocation3 + $0x40] sm:$0xff]  ;;  %v1654_v53 = vld [vmem:[#allocation3 + $0x1e8] sm:$0xff] }
 0x5f4   :  { %v1619_v40 = vld [vmem:[#allocation3 + $0xd0] sm:$0xff]  ;;  %v1656_v27 = vld [vmem:[#allocation3 + $0x1f8] sm:$0xff]  ;;  %v1653_v11 = vld [vmem:[#allocation3 + $0x1e0] sm:$0xff] }
 0x5f5   :  { %v1603_v8 = vld [vmem:[#allocation3 + $0x50] sm:$0xff]  ;;  %v1638_v13 = vld [vmem:[#allocation3 + $0x168] sm:$0xff]  ;;  %v1637_v18 = vld [vmem:[#allocation3 + $0x160] sm:$0xff] }
 0x5f6   :  { %v1589_v21 = vld [vmem:[#allocation2] sm:$0xff]  ;;  %v1655_v15 = vld [vmem:[#allocation3 + $0x1f0] sm:$0xff]  ;;  %v1622_v19 = vld [vmem:[#allocation3 + $0xe8] sm:$0xff] }
 0x5f7   :  { %v1672_v62 = vrot.slane %v1589_v21, %v3311_v20  ;;  %v1665_v22 = vcombine.high %v1589_v21, %v1589_v21  ;;  %v1591_v42 = vld [vmem:[#allocation2 + $0x10] sm:$0xff]  ;;  %v1624_v21 = vld [vmem:[#allocation3 + $0xf8] sm:$0xff] }
 0x5f8   :  { %v1590_v23 = vld [vmem:[#allocation2 + $0x8] sm:$0xff]  ;;  %v1699_v47 = vcombine.high %v1591_v42, %v1591_v42  ;;  %v1706_v26 = vrot.slane %v1591_v42, %v3311_v20  ;;  %v1592_v61 = vld [vmem:[#allocation2 + $0x18] sm:$0xff] }
 0x5f9   :  { %v1680_v4 = vcombine.high %v1672_v62, %v1672_v62  ;;  %v1679_v24 = vrot.slane %v1665_v22, %v3311_v20  ;;  %v1689_v28 = vrot.slane %v1590_v23, %v3311_v20  ;;  %v1682_v29 = vcombine.high %v1590_v23, %v1590_v23  ;;  %v1606_v22 = vld [vmem:[#allocation3 + $0x68] sm:$0xff]  ;;  %v1623_v23 = vld [vmem:[#allocation3 + $0xf0] sm:$0xff] }
 0x5fa   :  { %v1713_v31 = vrot.slane %v1699_v47, %v3311_v20  ;;  %v1714_v48 = vcombine.high %v1706_v26, %v1706_v26  ;;  %v1716_v6 = vcombine.high %v1592_v61, %v1592_v61  ;;  %v1723_v2 = vrot.slane %v1592_v61, %v3311_v20 }
 0x5fb   :  { %1813 = vmatprep.mubr.f32.mxu0 %v1680_v4  ;;  %v1681_v9 = vcombine.high %v1679_v24, %v1679_v24  ;;  %v1697_v32 = vcombine.high %v1689_v28, %v1689_v28  ;;  %v1696_v34 = vrot.slane %v1682_v29, %v3311_v20  ;;  %v1608_v4 = vld [vmem:[#allocation3 + $0x78] sm:$0xff]  ;;  %v44_v29 = vld [vmem:[%s3350_s2 + $0x48] sm:$0xff] }
 0x5fc   :  { %1814 = vmatmul.mubr.f32.vlgmr.msra.gmra.mxu0 %v1672_v62  ;;  %v1715_v54 = vcombine.high %v1713_v31, %v1713_v31  ;;  %v1730_v25 = vrot.slane %v1716_v6, %v3311_v20  ;;  %v1731_v12 = vcombine.high %v1723_v2, %v1723_v2  ;;  %v1639_v20 = vld [vmem:[#allocation3 + $0x170] sm:$0xff]  ;;  %v1621_v62 = vld [vmem:[#allocation3 + $0xe0] sm:$0xff] }
 0x5fd   :  { %1914 = vmatpush1.xpose.msra.mxu0 %v1645_v30  ;;  %1883 = vmatprep.mubr.f32.mxu1 %v1681_v9  ;;  %v1698_v3 = vcombine.high %v1696_v34, %v1696_v34  ;;  %v43_v30 = vld [vmem:[%s3350_s2 + $0x40] sm:$0xff]  ;;  %v42_v9 = vld [vmem:[%s3350_s2 + $0x38] sm:$0xff] }
 0x5fe   :  { %1953 = vmatprep.mubr.f32.mxu0 %v1697_v32  ;;  %1884 = vmatmul.mubr.f32.vlgmr.msra.gmra.mxu1 %v1679_v24  ;;  %v1732_v16 = vcombine.high %v1730_v25, %v1730_v25  ;;  %v1605_v24 = vld [vmem:[#allocation3 + $0x60] sm:$0xff]  ;;  %v41_v32 = vld [vmem:[%s3350_s2 + $0x30] sm:$0xff] }
 0x5ff   :  { %1984 = vmatpush1.xpose.msra.mxu1 %v1647_v35  ;;  %1915 = vmatprep.subr.mxu0 %v1630_v36 }
 0x600   :  { %2023 = vmatprep.mubr.f32.mxu1 %v1698_v3  ;;  %1985 = vmatprep.subr.mxu1 %v1632_v1 }
 0x601   :  { %1916 = vmatpush1.xpose.msra.mxu0 %v1629_v37 }
 0x602   :  { %1917 = vmatprep.subr.mxu0 %v1614_v5 }
 0x603   :  { %1986 = vmatpush1.xpose.msra.mxu1 %v1631_v38 }
 0x604   :  { %1987 = vmatprep.subr.mxu1 %v1616_v39  ;;  %v2413_v39 = vld [vmem:[%s3350_s2 + $0x50] ss:$0 sm:$0xff] }
 0x605   :  { %1918 = vmatpush1.xpose.msra.mxu0 %v1613_v0 }
 0x606   :  { %1919 = vmatprep.subr.mxu0 %v1598_v44 }
 0x607   :  { %1988 = vmatpush1.xpose.msra.mxu1 %v1615_v51 }
 0x608   :  { %1989 = vmatprep.subr.mxu1 %v1600_v45 }
 0x609   :  { %1920 = vmatpush1.xpose.msra.mxu0 %v1597_v46 }
 0x60a   :  { %2053 = vmatprep.subr.mxu0 %v1650_v43 }
 0x60b   :  { %1990 = vmatpush1.xpose.msra.mxu1 %v1599_v49 }
 0x60c   :  { %1954 = vmatmul.mubr.f32.vlgmr.msra.gmra.mxu0 %v1689_v28  ;;  %2123 = vmatprep.subr.mxu1 %v1652_v52  ;;  %v1607_v28 = vld [vmem:[#allocation3 + $0x70] sm:$0xff] }
 0x60d   :  { %2054 = vmatpush1.xpose.msra.mxu0 %v1649_v50  ;;  %2093 = vmatprep.mubr.f32.mxu0 %v1714_v48 }
 0x60e   :  { %2024 = vmatmul.mubr.f32.vlgmr.msra.gmra.mxu1 %v1696_v34  ;;  %2055 = vmatprep.subr.mxu0 %v1634_v10 }
 0x60f   :  { %2124 = vmatpush1.xpose.msra.mxu1 %v1651_v33  ;;  %2163 = vmatprep.mubr.f32.mxu1 %v1715_v54  ;;  %v2414_v54 = vld [vmem:[%s3350_s2 + $0x58] ss:$0 sm:$0xff] }
 0x610   :  { %2125 = vmatprep.subr.mxu1 %v1636_v55 }
 0x611   :  { %2056 = vmatpush1.xpose.msra.mxu0 %v1633_v56 }
 0x612   :  { %2057 = vmatprep.subr.mxu0 %v1618_v57 }
 0x613   :  { %2126 = vmatpush1.xpose.msra.mxu1 %v1635_v58 }
 0x614   :  { %2127 = vmatprep.subr.mxu1 %v1620_v60 }
 0x615   :  { %2058 = vmatpush1.xpose.msra.mxu0 %v1617_v41 }
 0x616   :  { %2059 = vmatprep.subr.mxu0 %v1602_v59 }
 0x617   :  { %2128 = vmatpush1.xpose.msra.mxu1 %v1619_v40 }
 0x618   :  { %2129 = vmatprep.subr.mxu1 %v1604_v63 }
 0x619   :  { %2060 = vmatpush1.xpose.msra.mxu0 %v1601_v7 }
 0x61a   :  { %2193 = vmatprep.subr.mxu0 %v1654_v53 }
 0x61b   :  { %2130 = vmatpush1.xpose.msra.mxu1 %v1603_v8 }
 0x61c   :  { %2094 = vmatmul.mubr.f32.vlgmr.msra.gmra.mxu0 %v1706_v26  ;;  %2263 = vmatprep.subr.mxu1 %v1656_v27 }
 0x61d   :  { %2194 = vmatpush1.xpose.msra.mxu0 %v1653_v11  ;;  %2233 = vmatprep.mubr.f32.mxu0 %v1731_v12 }
 0x61e   :  { %2164 = vmatmul.mubr.f32.vlgmr.msra.gmra.mxu1 %v1713_v31  ;;  %2195 = vmatprep.subr.mxu0 %v1638_v13 }
 0x61f   :  { %2264 = vmatpush1.xpose.msra.mxu1 %v1655_v15  ;;  %2303 = vmatprep.mubr.f32.mxu1 %v1732_v16 }
 0x620   :  { %2265 = vmatprep.subr.mxu1 %v1640_v17 }
 0x621   :  { %2196 = vmatpush1.xpose.msra.mxu0 %v1637_v18 }
 0x622   :  { %2197 = vmatprep.subr.mxu0 %v1622_v19 }
 0x623   :  { %2266 = vmatpush1.xpose.msra.mxu1 %v1639_v20 }
 0x624   :  { %2267 = vmatprep.subr.mxu1 %v1624_v21 }
 0x625   :  { %2198 = vmatpush1.xpose.msra.mxu0 %v1621_v62 }
 0x626   :  { %2199 = vmatprep.subr.mxu0 %v1606_v22 }
 0x627   :  { %2268 = vmatpush1.xpose.msra.mxu1 %v1623_v23 }
 0x628   :  { %2269 = vmatprep.subr.mxu1 %v1608_v4 }
 0x629   :  { %2200 = vmatpush1.xpose.msra.mxu0 %v1605_v24 }
 0x62a   :  { %2452 = vmatprep.subr.mxu0 %v2543_v14 }
 0x62b   :  { %2270 = vmatpush1.xpose.msra.mxu1 %v1607_v28 }
 0x62c   :  { %2234 = vmatmul.mubr.f32.vlgmr.msra.gmra.mxu0 %v1723_v2 }
 0x62d   :  { %2460 = vmatprep.mubr.msk.f32.mxu0 %vm2545_vm10, %v2543_v14  ;;  %2453 = vmatpush3.msra.mxu0 %v44_v29 }
 0x62e   :  { %2304 = vmatmul.mubr.f32.vlgmr.msra.gmra.mxu1 %v1730_v25  ;;  %2454 = vmatprep.subr.mxu0 %v2543_v14 }
 0x62f   :  { %2455 = vmatpush3.msra.mxu0 %v43_v30 }
 0x630   :  { %2456 = vmatprep.subr.mxu0 %v2543_v14 }
 0x631   :  { %2457 = vmatpush3.msra.mxu0 %v42_v9 }
 0x632   :  { %2458 = vmatprep.subr.mxu0 %v2543_v14 }
 0x633   :  { %2459 = vmatpush3.msra.mxu0 %v41_v32 }
 0x6bc   :  { %v1815_v34 = vpop.f32.mrf.mxu0 }
 0x6bd   :  { %v1816_v0 = vadd.f32 %v2413_v39, %v1815_v34 }
 0x6be   :  { %v1817_v35 = vpop.f32.mrf.mxu0  ;;  %v1885_v36 = vpop.f32.mrf.mxu1 }
 0x6bf   :  { %v1886_v51 = vadd.f32 %v1885_v36, %v1816_v0 }
 0x6c0   :  { %v1887_v3 = vpop.f32.mrf.mxu1 }
 0x6cc   :  { %v1955_v1 = vpop.f32.mrf.mxu0 }
 0x6cd   :  { %v1956_v47 = vadd.f32 %v1955_v1, %v1886_v51 }
 0x6ce   :  { %v1957_v37 = vpop.f32.mrf.mxu0  ;;  %v2025_v5 = vpop.f32.mrf.mxu1 }
 0x6cf   :  { %v2026_v46 = vadd.f32 %v2025_v5, %v1956_v47 }
 0x6d0   :  { %v2027_v38 = vpop.f32.mrf.mxu1 }
 0x6dc   :  { %v2095_v42 = vpop.f32.mrf.mxu0 }
 0x6dd   :  { %v2096_v43 = vadd.f32 %v2095_v42, %v2026_v46 }
 0x6de   :  { %v2097_v14 = vpop.f32.mrf.mxu0  ;;  %v2165_v44 = vpop.f32.mrf.mxu1 }
 0x6df   :  { %v2166_v26 = vadd.f32 %v2165_v44, %v2096_v43 }
 0x6e0   :  { %v2167_v45 = vpop.f32.mrf.mxu1 }
 0x6ec   :  { %v2235_v49 = vpop.f32.mrf.mxu0 }
 0x6ed   :  { %v2236_v52 = vadd.f32 %v2235_v49, %v2166_v26 }
 0x6ee   :  { %v2237_v31 = vpop.f32.mrf.mxu0  ;;  %v2305_v50 = vpop.f32.mrf.mxu1 }
 0x6ef   :  { %v2306_v48 = vadd.f32 %v2305_v50, %v2236_v52 }
 0x6f0   :  { %v2307_v10 = vpop.f32.mrf.mxu1 }
 0x6f1   :  { %v2309_v33 = vmax.f32 %v2306_v48, 0.0 }
 0x6f3   :  { %2461 = vmatmul.mubr.msk.f32.vlgmr.msra.gmra.mxu0 %vm2314_vm5, %v2309_v33 }
 0x7b3   :  { %v2384_v55 = vpop.f32.mrf.mxu0 }
 0x7b4   :  { %v2385_v56 = vadd.f32 %v2414_v54, %v2384_v55 }
 0x7b5   :  { %v2462_v57 = vpop.f32.mrf.mxu0 }
 0x7b6   :  { %2389 = vst.msk [vmem:[#allocation6] sm:$0x3] %vm2388_vm6, %v2385_v56 }
 0x7b7   :  { %2518 = shalt.err (!%p2515_p9)
}
 0x7b8   :  { %2399 = dma.vmem_to_hbm [thread:$0]  %s2397_s8, 32, %s3351_s3, [#allocation5]  }
 0x7b9   :  { %2529 = dma.done.wait [#allocation5], 32  }
 0x7ba   :  { %2530 = vsyncadd [#allocation5], 4294967264 }
 0x7bb   :  { %2403 = vsyncpa [#allocation4], 1 }
 0x7bc   :  { %2404 = vsyncpa [#allocation5], 1 }

</bundles_post_ra>
